<compile_context>
chip_gen: v7x
topology: tpu7x:2x2x1
jax: 0.10.0
libtpu: 0.0.40
codegen_flags: <defaults>
</compile_context>

<pallas_src>
import functools

import jax
import jax.numpy as jnp
from jax.experimental import pallas as pl
from jax.experimental.pallas import tpu as pltpu


# ----------------------------- model config --------------------------------

D_MODEL = 32
N_HEADS = 4
D_HEAD = D_MODEL // N_HEADS
FFN_DIM = 64
N_LAYERS = 2
FINAL_DIM = 16
NUM_CLASSES = 8
LOGIT_TEMP = 0.1           # fairseq HubertConfig.logit_temp
PRED_MASKED_WEIGHT = 1.0   # HubertCriterion.pred_masked_weight
FEATURE_PEN_WEIGHT = 10.0  # loss_weights=[10] for features_pen
CONV0 = (16, 10, 5)        # (C_out, kernel, stride), bias=False, GroupNorm+GELU
CONV1 = (32, 4, 2)         # (C_out, kernel, stride), bias=False, GELU


# ----------------------------- in-kernel helpers ----------------------------

def _ln(x, g, b, eps=1e-5):
    mu = jnp.mean(x, axis=-1, keepdims=True)
    var = jnp.mean((x - mu) ** 2, axis=-1, keepdims=True)
    return (x - mu) * jax.lax.rsqrt(var + eps) * g + b


# ----------------------------- Pallas kernels -------------------------------

def _conv0_gn_gelu_kernel(p_ref, w_ref, g_ref, b_ref, o_ref):
    # p_ref: (T1, K0) patches for one batch element; w_ref: (K0, C0) bf16.
    y = jnp.dot(p_ref[...].astype(jnp.bfloat16), w_ref[...],
                preferred_element_type=jnp.float32)                       # (T1, C0)
    # GroupNorm(C0, C0) == per-(batch, channel) normalization over time (axis 0 here).
    mu = jnp.mean(y, axis=0, keepdims=True)
    var = jnp.mean((y - mu) ** 2, axis=0, keepdims=True)
    y = (y - mu) * jax.lax.rsqrt(var + 1e-5) * g_ref[...] + b_ref[...]
    # TODO(synk): PyTorch nn.GELU is exact erf; tanh approximation used (max abs diff ~1e-3).
    o_ref[...] = jax.nn.gelu(y, approximate=True)


def conv0_gn_gelu(patches, w0m_bf16, g, b):
    B, T1, K0 = patches.shape
    C0 = w0m_bf16.shape[1]
    # TODO(synk): C0=16 (<128 lanes) output means masked stores; left as-is since C0 is a
    # model dim (resolves itself at real sizes where channel dims are multiples of 128).
    return pl.pallas_call(
        _conv0_gn_gelu_kernel,
        out_shape=jax.ShapeDtypeStruct((B, T1, C0), jnp.float32),
        grid=(B,),
        in_specs=[pl.BlockSpec((None, T1, K0), lambda bb: (bb, 0, 0)),
                  pl.BlockSpec((K0, C0), lambda bb: (0, 0)),
                  pl.BlockSpec((1, C0), lambda bb: (0, 0)),
                  pl.BlockSpec((1, C0), lambda bb: (0, 0))],
        out_specs=pl.BlockSpec((None, T1, C0), lambda bb: (bb, 0, 0)),
        compiler_params=pltpu.CompilerParams(dimension_semantics=("parallel",)),
    )(patches, w0m_bf16, g.reshape(1, C0), b.reshape(1, C0))


def _fused_encoder_kernel(
        # featurizer inputs
        p1_ref, w1_ref, fg_ref, fb_ref, pw_ref, pb_ref, me_ref, m_ref,
        eg_ref, eb_ref,
        # per-layer transformer weights (indexed by the layer grid axis)
        qkvw_ref, qkvb_ref, ow_ref, ob_ref, ln1g_ref, ln1b_ref,
        f1w_ref, f1b_ref, f2w_ref, f2b_ref, ln2g_ref, ln2b_ref,
        # NCE head inputs
        fw_ref, fpb_ref, embs_ref, t_ref,
        # outputs
        pen_ref, loss_ref,
        # scratch: activation resident in VMEM across the layer axis
        act_ref,
        *, heads, d_head, inv_temp):
    d_model = heads * d_head
    layer = pl.program_id(1)

    # -------- featurizer prologue (layer 0 only): seeds act_ref, writes features_pen row ----
    @pl.when(layer == 0)
    def _():
        feat = jnp.dot(p1_ref[...].astype(jnp.bfloat16), w1_ref[...],
                       preferred_element_type=jnp.float32)                # (T2, D)
        feat = jax.nn.gelu(feat, approximate=True)
        # per-batch sum of squares; mean taken in glue (lane-dense (8,128) output row).
        pen_ref[...] = jnp.full(pen_ref.shape, jnp.sum(feat * feat), jnp.float32)
        h = _ln(feat, fg_ref[...], fb_ref[...])
        h = jnp.dot(h.astype(jnp.bfloat16), pw_ref[...],
                    preferred_element_type=jnp.float32) + pb_ref[...]
        m = m_ref[...]                                                    # (T2, 1)
        h = h * (1.0 - m) + m * me_ref[...]
        # encoder LayerNorm (post-LN architecture applies it before the layer stack).
        act_ref[...] = _ln(h, eg_ref[...], eb_ref[...])

    # -------- one transformer encoder layer on the resident activation -----------------------
    x = act_ref[...]                                                      # (T2, D) f32
    xb = x.astype(jnp.bfloat16)
    # q-scale (head_dim**-0.5) is pre-folded into the Q columns of qkv_w / qkv_b in glue.
    qkv = jnp.dot(xb, qkvw_ref[...], preferred_element_type=jnp.float32) + qkvb_ref[...]
    q = qkv[:, :d_model]
    k = qkv[:, d_model:2 * d_model]
    v = qkv[:, 2 * d_model:]

    ctx_parts = []
    for h_idx in range(heads):
        sl = slice(h_idx * d_head, (h_idx + 1) * d_head)
        s = jnp.einsum('td,sd->ts',
                       q[:, sl].astype(jnp.bfloat16),
                       k[:, sl].astype(jnp.bfloat16),
                       preferred_element_type=jnp.float32)                # (T2, T2)
        s = s - jnp.max(s, axis=-1, keepdims=True)
        p = jnp.exp(s)
        p = p * pl.reciprocal(jnp.sum(p, axis=-1, keepdims=True), approx=True)
        ctx_parts.append(jnp.dot(p.astype(jnp.bfloat16),
                                 v[:, sl].astype(jnp.bfloat16),
                                 preferred_element_type=jnp.float32))     # (T2, dh)
    # single full-width output projection instead of H accumulating K=8 matmuls
    ctx = jnp.concatenate(ctx_parts, axis=-1)                             # (T2, D)
    attn_o = jnp.dot(ctx.astype(jnp.bfloat16), ow_ref[...],
                     preferred_element_type=jnp.float32) + ob_ref[...]

    h1 = _ln(x + attn_o, ln1g_ref[...], ln1b_ref[...])

    ff = jnp.dot(h1.astype(jnp.bfloat16), f1w_ref[...],
                 preferred_element_type=jnp.float32) + f1b_ref[...]
    ff = jax.nn.gelu(ff, approximate=True)
    ff = jnp.dot(ff.astype(jnp.bfloat16), f2w_ref[...],
                 preferred_element_type=jnp.float32) + f2b_ref[...]

    act_ref[...] = _ln(h1 + ff, ln2g_ref[...], ln2b_ref[...])

    # -------- NCE head epilogue (last layer only): per-batch masked CE sum -------------------
    @pl.when(layer == pl.num_programs(1) - 1)
    def _():
        proj = jnp.dot(act_ref[...].astype(jnp.bfloat16), fw_ref[...],
                       preferred_element_type=jnp.float32) + fpb_ref[...]  # (T2, F)
        xn = proj * jax.lax.rsqrt(jnp.sum(proj * proj, axis=-1, keepdims=True) + 1e-12)
        e = embs_ref[...]                                                  # (C, F)
        en = e * jax.lax.rsqrt(jnp.sum(e * e, axis=-1, keepdims=True) + 1e-12)
        logits = jnp.einsum('tf,cf->tc', xn, en,
                            preferred_element_type=jnp.float32) * inv_temp  # (T2, C)
        mx = jnp.max(logits, axis=-1, keepdims=True)
        lse = jnp.log(jnp.sum(jnp.exp(logits - mx), axis=-1, keepdims=True)) + mx
        # one-hot target term built in-kernel from int32 targets (no dense one-hot DMA).
        cls = jax.lax.broadcasted_iota(jnp.int32, logits.shape, 1)
        tgt = jnp.sum(jnp.where(cls == t_ref[...], logits, 0.0), axis=-1, keepdims=True)
        loss_val = jnp.sum((lse - tgt) * m_ref[...])
        loss_ref[...] = jnp.full(loss_ref.shape, loss_val, jnp.float32)


def fused_featurizer_encoder_nce(patches1, w1m, feat_p, enc, nce_p, maskf3, targets3):
    """One pallas_call: conv1 featurizer + L transformer layers + NCE head, grid=(B, L)."""
    B, T2, KC = patches1.shape
    D = D_MODEL
    L = enc["qkv_w"].shape[0]
    F = enc["fc1_w"].shape[2]
    Fd = nce_p["final_w"].shape[1]
    C = nce_p["label_embs"].shape[0]

    kernel = functools.partial(_fused_encoder_kernel, heads=N_HEADS,
                               d_head=D_HEAD, inv_temp=1.0 / LOGIT_TEMP)

    def cmap(b, l):   # constant blocks (weights fetched once; index never changes)
        return (0, 0)

    def bmap(b, l):   # per-batch blocks
        return (b, 0, 0)

    def lmap(b, l):   # per-layer weight blocks
        return (l, 0, 0)

    pen, loss = pl.pallas_call(
        kernel,
        out_shape=(jax.ShapeDtypeStruct((B, 8, 128), jnp.float32),   # features_pen rows
                   jax.ShapeDtypeStruct((B, 8, 128), jnp.float32)),  # masked-CE loss rows
        grid=(B, L),
        in_specs=[
            pl.BlockSpec((None, T2, KC), bmap),           # patches1
            pl.BlockSpec((KC, D), cmap),                  # conv1 weight (bf16)
            pl.BlockSpec((1, D), cmap),                   # feat_ln_g
            pl.BlockSpec((1, D), cmap),                   # feat_ln_b
            pl.BlockSpec((D, D), cmap),                   # post_extract_proj w (bf16)
            pl.BlockSpec((1, D), cmap),                   # post_extract_proj b
            pl.BlockSpec((1, D), cmap),                   # mask_emb
            pl.BlockSpec((None, T2, 1), bmap),            # mask (float)
            pl.BlockSpec((1, D), cmap),                   # enc_ln_g
            pl.BlockSpec((1, D), cmap),                   # enc_ln_b
            pl.BlockSpec((None, D, 3 * D), lmap),         # qkv_w (bf16, q-scale folded)
            pl.BlockSpec((None, 1, 3 * D), lmap),         # qkv_b
            pl.BlockSpec((None, D, D), lmap),             # o_w (bf16)
            pl.BlockSpec((None, 1, D), lmap),             # o_b
            pl.BlockSpec((None, 1, D), lmap),             # ln1_g
            pl.BlockSpec((None, 1, D), lmap),             # ln1_b
            pl.BlockSpec((None, D, F), lmap),             # fc1_w (bf16)
            pl.BlockSpec((None, 1, F), lmap),             # fc1_b
            pl.BlockSpec((None, F, D), lmap),             # fc2_w (bf16)
            pl.BlockSpec((None, 1, D), lmap),             # fc2_b
            pl.BlockSpec((None, 1, D), lmap),             # ln2_g
            pl.BlockSpec((None, 1, D), lmap),             # ln2_b
            pl.BlockSpec((D, Fd), cmap),                  # final_proj w (bf16)
            pl.BlockSpec((1, Fd), cmap),                  # final_proj b
            pl.BlockSpec((C, Fd), cmap),                  # label_embs
            pl.BlockSpec((None, T2, 1), bmap),            # targets (int32)
        ],
        out_specs=(pl.BlockSpec((None, 8, 128), bmap),
                   pl.BlockSpec((None, 8, 128), bmap)),
        scratch_shapes=[pltpu.VMEM((T2, D), jnp.float32)],
        compiler_params=pltpu.CompilerParams(
            dimension_semantics=("parallel", "arbitrary")),
    )(patches1, w1m,
      feat_p["feat_ln_g"].reshape(1, D), feat_p["feat_ln_b"].reshape(1, D),
      feat_p["post_w"], feat_p["post_b"].reshape(1, D),
      feat_p["mask_emb"].reshape(1, D), maskf3,
      feat_p["enc_ln_g"].reshape(1, D), feat_p["enc_ln_b"].reshape(1, D),
      enc["qkv_w"], enc["qkv_b"], enc["o_w"], enc["o_b"],
      enc["ln1_g"], enc["ln1_b"], enc["fc1_w"], enc["fc1_b"],
      enc["fc2_w"], enc["fc2_b"], enc["ln2_g"], enc["ln2_b"],
      nce_p["final_w"], nce_p["final_b"].reshape(1, Fd),
      nce_p["label_embs"], targets3)
    return pen, loss


# ------------------------------- JAX glue -----------------------------------

def im2col_time_major(x, K, stride):
    """x: (B, T, C) time-major -> patches (B, T_out, K*C); column ordering (k, c)."""
    # TODO(synk): at real waveform lengths this K-times-expanded patch tensor should be formed
    # in-kernel (strided taps) instead of in HBM.
    B, T, C = x.shape
    T_out = (T - K) // stride + 1
    idx = stride * jnp.arange(T_out)[:, None] + jnp.arange(K)[None, :]   # (T_out, K)
    patches = x[:, idx, :]                                                # (B, T_out, K, C)
    return patches.reshape(B, T_out, K * C), T_out


def prep_encoder_weights(enc):
    """Fold the fairseq head_dim**-0.5 q-scale into qkv_{w,b} and cast matmul weights to bf16."""
    D = D_MODEL
    s = D_HEAD ** -0.5
    qkv_w = enc["qkv_w"].at[:, :, :D].multiply(s)
    qkv_b = enc["qkv_b"].at[:, :, :D].multiply(s)
    return {
        "qkv_w": qkv_w.astype(jnp.bfloat16), "qkv_b": qkv_b,
        "o_w": enc["o_w"].astype(jnp.bfloat16), "o_b": enc["o_b"],
        "ln1_g": enc["ln1_g"], "ln1_b": enc["ln1_b"],
        "fc1_w": enc["fc1_w"].astype(jnp.bfloat16), "fc1_b": enc["fc1_b"],
        "fc2_w": enc["fc2_w"].astype(jnp.bfloat16), "fc2_b": enc["fc2_b"],
        "ln2_g": enc["ln2_g"], "ln2_b": enc["ln2_b"],
    }


def init_params(key):
    ks = iter(jax.random.split(key, 16))

    def nrm(shape, scale=0.02):
        return scale * jax.random.normal(next(ks), shape, dtype=jnp.float32)

    L, D, F = N_LAYERS, D_MODEL, FFN_DIM
    return {
        "conv0_w": nrm((CONV0[0], 1, CONV0[1]), 0.1),          # PyTorch Conv1d (C_out, C_in, K)
        "gn0_g": jnp.ones((CONV0[0],), jnp.float32),
        "gn0_b": jnp.zeros((CONV0[0],), jnp.float32),
        "conv1_w": nrm((CONV1[0], CONV0[0], CONV1[1]), 0.1),
        "feat_ln_g": jnp.ones((D,), jnp.float32),
        "feat_ln_b": jnp.zeros((D,), jnp.float32),
        "post_w": nrm((D, D)),
        "post_b": jnp.zeros((D,), jnp.float32),
        "mask_emb": jax.random.uniform(next(ks), (D,), jnp.float32),
        "enc_ln_g": jnp.ones((D,), jnp.float32),
        "enc_ln_b": jnp.zeros((D,), jnp.float32),
        "final_w": nrm((D, FINAL_DIM)),
        "final_b": jnp.zeros((FINAL_DIM,), jnp.float32),
        "label_embs": jax.random.uniform(next(ks), (NUM_CLASSES, FINAL_DIM), jnp.float32),
        "enc": {                                        # per-layer weights stacked on a leading L axis
            "qkv_w": nrm((L, D, 3 * D)), "qkv_b": jnp.zeros((L, 1, 3 * D), jnp.float32),
            "o_w": nrm((L, D, D)), "o_b": jnp.zeros((L, 1, D), jnp.float32),
            "ln1_g": jnp.ones((L, 1, D), jnp.float32), "ln1_b": jnp.zeros((L, 1, D), jnp.float32),
            "fc1_w": nrm((L, D, F)), "fc1_b": jnp.zeros((L, 1, F), jnp.float32),
            "fc2_w": nrm((L, F, D)), "fc2_b": jnp.zeros((L, 1, D), jnp.float32),
            "ln2_g": jnp.ones((L, 1, D), jnp.float32), "ln2_b": jnp.zeros((L, 1, D), jnp.float32),
        },
    }


def hubert_pretrain_forward(params, data, mask_indices):
    """Mirrors HuBERTPretrainer.forward: criterion(model, data) -> (loss, sample_size)."""
    source = data["net_input"]["source"]          # (B, T_wav)
    # TODO(synk): padding_mask handling omitted — synthetic batch has no padded frames.
    targets = data["target_list"][0]              # (B, T_frames) int32
    B = source.shape[0]
    D = D_MODEL

    # --- conv feature extractor (Conv1d NCW expressed as time-major patch matmuls) ---
    x_t = source[:, :, None]                                              # (B, T_wav, 1)
    patches0, T1 = im2col_time_major(x_t, CONV0[1], CONV0[2])             # (B, T1, K0)
    w0m = jnp.transpose(params["conv0_w"], (2, 1, 0)).reshape(
        CONV0[1] * 1, CONV0[0]).astype(jnp.bfloat16)
    y = conv0_gn_gelu(patches0, w0m, params["gn0_g"], params["gn0_b"])    # (B, T1, C0)

    patches1, T2 = im2col_time_major(y, CONV1[1], CONV1[2])               # (B, T2, K1*C0)
    w1m = jnp.transpose(params["conv1_w"], (2, 1, 0)).reshape(
        CONV1[1] * CONV0[0], CONV1[0]).astype(jnp.bfloat16)

    maskf3 = mask_indices.astype(jnp.float32)[:, :, None]                 # (B, T2, 1)
    targets3 = targets.astype(jnp.int32)[:, :, None]                      # (B, T2, 1)

    feat_p = {
        "feat_ln_g": params["feat_ln_g"], "feat_ln_b": params["feat_ln_b"],
        "post_w": params["post_w"].astype(jnp.bfloat16), "post_b": params["post_b"],
        "mask_emb": params["mask_emb"],
        "enc_ln_g": params["enc_ln_g"], "enc_ln_b": params["enc_ln_b"],
    }
    nce_p = {
        "final_w": params["final_w"].astype(jnp.bfloat16),
        "final_b": params["final_b"],
        "label_embs": params["label_embs"],
    }
    enc_p = prep_encoder_weights(params["enc"])

    # --- fused featurizer + transformer encoder (post-LN) + NCE head in ONE pallas_call ---
    # TODO(synk): fairseq convolutional positional embedding (pos_conv) omitted.
    pen_rows, loss_rows = fused_featurizer_encoder_nce(
        patches1, w1m, feat_p, enc_p, nce_p, maskf3, targets3)

    features_pen = jnp.sum(pen_rows[:, 0, 0]) / float(B * T2 * D)         # mean(features**2)
    loss_m = jnp.sum(loss_rows[:, 0, 0])                                  # masked-CE sum

    sample_size = jnp.sum(mask_indices).astype(jnp.int32)                 # masked target count
    # HubertCriterion: pred_masked_weight*loss_m (+ pred_nomask_weight*loss_u==0)
    #                  + loss_weights[0] * features_pen * sample_size
    loss = (PRED_MASKED_WEIGHT * loss_m
            + FEATURE_PEN_WEIGHT * features_pen * sample_size.astype(jnp.float32))
    return loss, sample_size


# --------------------------------- main --------------------------------------

if __name__ == "__main__":
    key = jax.random.PRNGKey(0)
    pkey, wkey, tkey, mkey = jax.random.split(key, 4)
    params = init_params(pkey)

    B, T_WAV = 2, 175
    T1 = (T_WAV - CONV0[1]) // CONV0[2] + 1      # 34
    T_FRAMES = (T1 - CONV1[1]) // CONV1[2] + 1   # 16

    source = jax.random.normal(wkey, (B, T_WAV), jnp.float32)
    targets = jax.random.randint(tkey, (B, T_FRAMES), 0, NUM_CLASSES, dtype=jnp.int32)
    # TODO(synk): fairseq compute_mask_indices (span masking, numpy RNG) replaced by a
    # deterministic Bernoulli mask; at least one masked frame per sequence is enforced.
    mask = jax.random.bernoulli(mkey, 0.5, (B, T_FRAMES))
    mask = mask.at[:, 0].set(True)

    data = {
        "net_input": {
            "source": source,
            "padding_mask": jnp.zeros((B, T_FRAMES), jnp.bool_),
        },
        "target_list": [targets],
    }

    fwd = jax.jit(hubert_pretrain_forward)
    loss, sample_size = fwd(params, data, mask)
    jax.block_until_ready(loss)
    jax.block_until_ready(sample_size)
    print("KERNEL_OK")
</pallas_src>

<mosaic_0001>
module attributes {stable_mosaic.version = 11 : i64} {
  func.func @_conv0_gn_gelu_kernel(%arg0: i32, %arg1: memref<1x34x10xf32, #tpu.memory_space<vmem>>, %arg2: memref<10x16xbf16, #tpu.memory_space<vmem>>, %arg3: memref<1x16xf32, #tpu.memory_space<vmem>>, %arg4: memref<1x16xf32, #tpu.memory_space<vmem>>, %arg5: memref<1x34x16xf32, #tpu.memory_space<vmem>>) attributes {dimension_semantics = [#tpu.dimension_semantics<parallel>], iteration_bounds = array<i64: 2>, scalar_prefetch = 0 : i64, scratch_operands = 0 : i64, tpu.core_type = #tpu.core_type<tc>, window_params = [{transform_indices = @transform_0, window_bounds = array<i64: 1, 34, 10>}, {pipeline_mode = #tpu.pipeline_mode<synchronous>, transform_indices = @transform_1, window_bounds = array<i64: 10, 16>}, {pipeline_mode = #tpu.pipeline_mode<synchronous>, transform_indices = @transform_2, window_bounds = array<i64: 1, 16>}, {pipeline_mode = #tpu.pipeline_mode<synchronous>, transform_indices = @transform_3, window_bounds = array<i64: 1, 16>}, {transform_indices = @transform_4, window_bounds = array<i64: 1, 34, 16>}]} {
    %c0 = arith.constant 0 : index
    %c0_0 = arith.constant 0 : index
    %c0_1 = arith.constant 0 : index
    %0 = vector.load %arg1[%c0, %c0_0, %c0_1] : memref<1x34x10xf32, #tpu.memory_space<vmem>>, vector<1x34x10xf32>
    %1 = vector.shape_cast %0 : vector<1x34x10xf32> to vector<34x10xf32>
    %2 = arith.truncf %1 : vector<34x10xf32> to vector<34x10xbf16>
    %c0_2 = arith.constant 0 : index
    %c0_3 = arith.constant 0 : index
    %3 = vector.load %arg2[%c0_2, %c0_3] : memref<10x16xbf16, #tpu.memory_space<vmem>>, vector<10x16xbf16>
    %cst = arith.constant dense<0.000000e+00> : vector<34x16xf32>
    %4 = tpu.matmul %2, %3, %cst {dimension_numbers = #tpu.dot_dimension_numbers<[1], [0], [0], [1], [0, 0, 1, 1], [], []>} : vector<34x10xbf16>, vector<10x16xbf16>, vector<34x16xf32> -> vector<34x16xf32>
    %cst_4 = arith.constant dense<0.000000e+00> : vector<16xf32>
    %5 = vector.multi_reduction <add>, %4, %cst_4 [0] : vector<34x16xf32> to vector<16xf32>
    %6 = vector.shape_cast %5 : vector<16xf32> to vector<1x16xf32>
    %cst_5 = arith.constant 3.400000e+01 : f32
    %7 = vector.broadcast %cst_5 : f32 to vector<1x16xf32>
    %8 = arith.divf %6, %7 : vector<1x16xf32>
    %9 = vector.broadcast %8 : vector<1x16xf32> to vector<34x16xf32>
    %10 = arith.subf %4, %9 : vector<34x16xf32>
    %11 = arith.mulf %10, %10 : vector<34x16xf32>
    %cst_6 = arith.constant dense<0.000000e+00> : vector<16xf32>
    %12 = vector.multi_reduction <add>, %11, %cst_6 [0] : vector<34x16xf32> to vector<16xf32>
    %13 = vector.shape_cast %12 : vector<16xf32> to vector<1x16xf32>
    %cst_7 = arith.constant 3.400000e+01 : f32
    %14 = vector.broadcast %cst_7 : f32 to vector<1x16xf32>
    %15 = arith.divf %13, %14 : vector<1x16xf32>
    %16 = vector.broadcast %8 : vector<1x16xf32> to vector<34x16xf32>
    %17 = arith.subf %4, %16 : vector<34x16xf32>
    %cst_8 = arith.constant 9.99999974E-6 : f32
    %18 = vector.broadcast %cst_8 : f32 to vector<1x16xf32>
    %19 = arith.addf %15, %18 : vector<1x16xf32>
    %20 = math.rsqrt %19 : vector<1x16xf32>
    %21 = vector.broadcast %20 : vector<1x16xf32> to vector<34x16xf32>
    %22 = arith.mulf %17, %21 : vector<34x16xf32>
    %c0_9 = arith.constant 0 : index
    %c0_10 = arith.constant 0 : index
    %23 = vector.load %arg3[%c0_9, %c0_10] : memref<1x16xf32, #tpu.memory_space<vmem>>, vector<1x16xf32>
    %24 = vector.broadcast %23 : vector<1x16xf32> to vector<34x16xf32>
    %25 = arith.mulf %22, %24 : vector<34x16xf32>
    %c0_11 = arith.constant 0 : index
    %c0_12 = arith.constant 0 : index
    %26 = vector.load %arg4[%c0_11, %c0_12] : memref<1x16xf32, #tpu.memory_space<vmem>>, vector<1x16xf32>
    %27 = vector.broadcast %26 : vector<1x16xf32> to vector<34x16xf32>
    %28 = arith.addf %25, %27 : vector<34x16xf32>
    %29 = arith.mulf %28, %28 : vector<34x16xf32>
    %30 = arith.mulf %28, %29 : vector<34x16xf32>
    %cst_13 = arith.constant 4.471500e-02 : f32
    %31 = vector.broadcast %cst_13 : f32 to vector<34x16xf32>
    %32 = arith.mulf %31, %30 : vector<34x16xf32>
    %33 = arith.addf %28, %32 : vector<34x16xf32>
    %cst_14 = arith.constant 0.797884583 : f32
    %34 = vector.broadcast %cst_14 : f32 to vector<34x16xf32>
    %35 = arith.mulf %34, %33 : vector<34x16xf32>
    %36 = math.tanh %35 : vector<34x16xf32>
    %cst_15 = arith.constant 1.000000e+00 : f32
    %37 = vector.broadcast %cst_15 : f32 to vector<34x16xf32>
    %38 = arith.addf %37, %36 : vector<34x16xf32>
    %cst_16 = arith.constant 5.000000e-01 : f32
    %39 = vector.broadcast %cst_16 : f32 to vector<34x16xf32>
    %40 = arith.mulf %39, %38 : vector<34x16xf32>
    %41 = arith.mulf %28, %40 : vector<34x16xf32>
    %c0_17 = arith.constant 0 : index
    %c0_18 = arith.constant 0 : index
    %c0_19 = arith.constant 0 : index
    %42 = vector.load %arg5[%c0_17, %c0_18, %c0_19] : memref<1x34x16xf32, #tpu.memory_space<vmem>>, vector<1x34x16xf32>
    %43 = vector.shape_cast %42 : vector<1x34x16xf32> to vector<34x16xf32>
    %44 = vector.shape_cast %41 : vector<34x16xf32> to vector<1x34x16xf32>
    tpu.vector_store %arg5[%c0_17, %c0_18, %c0_19], %44 {strides = array<i32>} : memref<1x34x16xf32, #tpu.memory_space<vmem>>, vector<1x34x16xf32>,
    return
  }
  func.func @transform_0(%arg0: i32) -> (i32, i32, i32) {
    %c0_i32 = arith.constant 0 : i32
    %c0_i32_0 = arith.constant 0 : i32
    %c0_i32_1 = arith.constant 0 : i32
    return %arg0, %c0_i32, %c0_i32_0 : i32, i32, i32
  }
  func.func @transform_1(%arg0: i32) -> (i32, i32) {
    %c0_i32 = arith.constant 0 : i32
    %c0_i32_0 = arith.constant 0 : i32
    %c0_i32_1 = arith.constant 0 : i32
    return %c0_i32, %c0_i32_0 : i32, i32
  }
  func.func @transform_2(%arg0: i32) -> (i32, i32) {
    %c0_i32 = arith.constant 0 : i32
    %c0_i32_0 = arith.constant 0 : i32
    %c0_i32_1 = arith.constant 0 : i32
    return %c0_i32, %c0_i32_0 : i32, i32
  }
  func.func @transform_3(%arg0: i32) -> (i32, i32) {
    %c0_i32 = arith.constant 0 : i32
    %c0_i32_0 = arith.constant 0 : i32
    %c0_i32_1 = arith.constant 0 : i32
    return %c0_i32, %c0_i32_0 : i32, i32
  }
  func.func @transform_4(%arg0: i32) -> (i32, i32, i32) {
    %c0_i32 = arith.constant 0 : i32
    %c0_i32_0 = arith.constant 0 : i32
    %c0_i32_1 = arith.constant 0 : i32
    return %arg0, %c0_i32, %c0_i32_0 : i32, i32, i32
  }
}

module attributes {stable_mosaic.version = 11 : i64} {
  func.func @_fused_encoder_kernel(%arg0: i32, %arg1: i32, %arg2: memref<1x16x64xf32, #tpu.memory_space<vmem>>, %arg3: memref<64x32xbf16, #tpu.memory_space<vmem>>, %arg4: memref<1x32xf32, #tpu.memory_space<vmem>>, %arg5: memref<1x32xf32, #tpu.memory_space<vmem>>, %arg6: memref<32x32xbf16, #tpu.memory_space<vmem>>, %arg7: memref<1x32xf32, #tpu.memory_space<vmem>>, %arg8: memref<1x32xf32, #tpu.memory_space<vmem>>, %arg9: memref<1x16x1xf32, #tpu.memory_space<vmem>>, %arg10: memref<1x32xf32, #tpu.memory_space<vmem>>, %arg11: memref<1x32xf32, #tpu.memory_space<vmem>>, %arg12: memref<1x32x96xbf16, #tpu.memory_space<vmem>>, %arg13: memref<1x1x96xf32, #tpu.memory_space<vmem>>, %arg14: memref<1x32x32xbf16, #tpu.memory_space<vmem>>, %arg15: memref<1x1x32xf32, #tpu.memory_space<vmem>>, %arg16: memref<1x1x32xf32, #tpu.memory_space<vmem>>, %arg17: memref<1x1x32xf32, #tpu.memory_space<vmem>>, %arg18: memref<1x32x64xbf16, #tpu.memory_space<vmem>>, %arg19: memref<1x1x64xf32, #tpu.memory_space<vmem>>, %arg20: memref<1x64x32xbf16, #tpu.memory_space<vmem>>, %arg21: memref<1x1x32xf32, #tpu.memory_space<vmem>>, %arg22: memref<1x1x32xf32, #tpu.memory_space<vmem>>, %arg23: memref<1x1x32xf32, #tpu.memory_space<vmem>>, %arg24: memref<32x16xbf16, #tpu.memory_space<vmem>>, %arg25: memref<1x16xf32, #tpu.memory_space<vmem>>, %arg26: memref<8x16xf32, #tpu.memory_space<vmem>>, %arg27: memref<1x16x1xi32, #tpu.memory_space<vmem>>, %arg28: memref<1x8x128xf32, #tpu.memory_space<vmem>>, %arg29: memref<1x8x128xf32, #tpu.memory_space<vmem>>, %arg30: memref<16x32xf32, #tpu.memory_space<vmem>>) attributes {dimension_semantics = [#tpu.dimension_semantics<parallel>, #tpu.dimension_semantics<arbitrary>], iteration_bounds = array<i64: 2, 2>, scalar_prefetch = 0 : i64, scratch_operands = 1 : i64, tpu.core_type = #tpu.core_type<tc>, window_params = [{transform_indices = @transform_0, window_bounds = array<i64: 1, 16, 64>}, {pipeline_mode = #tpu.pipeline_mode<synchronous>, transform_indices = @transform_1, window_bounds = array<i64: 64, 32>}, {pipeline_mode = #tpu.pipeline_mode<synchronous>, transform_indices = @transform_2, window_bounds = array<i64: 1, 32>}, {pipeline_mode = #tpu.pipeline_mode<synchronous>, transform_indices = @transform_3, window_bounds = array<i64: 1, 32>}, {pipeline_mode = #tpu.pipeline_mode<synchronous>, transform_indices = @transform_4, window_bounds = array<i64: 32, 32>}, {pipeline_mode = #tpu.pipeline_mode<synchronous>, transform_indices = @transform_5, window_bounds = array<i64: 1, 32>}, {pipeline_mode = #tpu.pipeline_mode<synchronous>, transform_indices = @transform_6, window_bounds = array<i64: 1, 32>}, {transform_indices = @transform_7, window_bounds = array<i64: 1, 16, 1>}, {pipeline_mode = #tpu.pipeline_mode<synchronous>, transform_indices = @transform_8, window_bounds = array<i64: 1, 32>}, {pipeline_mode = #tpu.pipeline_mode<synchronous>, transform_indices = @transform_9, window_bounds = array<i64: 1, 32>}, {transform_indices = @transform_10, window_bounds = array<i64: 1, 32, 96>}, {transform_indices = @transform_11, window_bounds = array<i64: 1, 1, 96>}, {transform_indices = @transform_12, window_bounds = array<i64: 1, 32, 32>}, {transform_indices = @transform_13, window_bounds = array<i64: 1, 1, 32>}, {transform_indices = @transform_14, window_bounds = array<i64: 1, 1, 32>}, {transform_indices = @transform_15, window_bounds = array<i64: 1, 1, 32>}, {transform_indices = @transform_16, window_bounds = array<i64: 1, 32, 64>}, {transform_indices = @transform_17, window_bounds = array<i64: 1, 1, 64>}, {transform_indices = @transform_18, window_bounds = array<i64: 1, 64, 32>}, {transform_indices = @transform_19, window_bounds = array<i64: 1, 1, 32>}, {transform_indices = @transform_20, window_bounds = array<i64: 1, 1, 32>}, {transform_indices = @transform_21, window_bounds = array<i64: 1, 1, 32>}, {pipeline_mode = #tpu.pipeline_mode<synchronous>, transform_indices = @transform_22, window_bounds = array<i64: 32, 16>}, {pipeline_mode = #tpu.pipeline_mode<synchronous>, transform_indices = @transform_23, window_bounds = array<i64: 1, 16>}, {pipeline_mode = #tpu.pipeline_mode<synchronous>, transform_indices = @transform_24, window_bounds = array<i64: 8, 16>}, {transform_indices = @transform_25, window_bounds = array<i64: 1, 16, 1>}, {transform_indices = @transform_26, window_bounds = array<i64: 1, 8, 128>}, {transform_indices = @transform_27, window_bounds = array<i64: 1, 8, 128>}]} {
    %c0_i32 = arith.constant 0 : i32
    %0 = arith.cmpi eq, %arg1, %c0_i32 : i32
    %1 = arith.extui %0 : i1 to i32
    %c0_i32_0 = arith.constant 0 : i32
    %2 = arith.cmpi ne, %1, %c0_i32_0 : i32
    scf.if %2 {
      %c0_74 = arith.constant 0 : index
      %c0_75 = arith.constant 0 : index
      %c0_76 = arith.constant 0 : index
      %187 = vector.load %arg2[%c0_74, %c0_75, %c0_76] : memref<1x16x64xf32, #tpu.memory_space<vmem>>, vector<1x16x64xf32>
      %188 = vector.shape_cast %187 : vector<1x16x64xf32> to vector<16x64xf32>
      %189 = arith.truncf %188 : vector<16x64xf32> to vector<16x64xbf16>
      %c0_77 = arith.constant 0 : index
      %c0_78 = arith.constant 0 : index
      %190 = vector.load %arg3[%c0_77, %c0_78] : memref<64x32xbf16, #tpu.memory_space<vmem>>, vector<64x32xbf16>
      %cst_79 = arith.constant dense<0.000000e+00> : vector<16x32xf32>
      %191 = tpu.matmul %189, %190, %cst_79 {dimension_numbers = #tpu.dot_dimension_numbers<[1], [0], [0], [1], [0, 0, 1, 1], [], []>} : vector<16x64xbf16>, vector<64x32xbf16>, vector<16x32xf32> -> vector<16x32xf32>
      %192 = arith.mulf %191, %191 : vector<16x32xf32>
      %193 = arith.mulf %191, %192 : vector<16x32xf32>
      %cst_80 = arith.constant 4.471500e-02 : f32
      %194 = vector.broadcast %cst_80 : f32 to vector<16x32xf32>
      %195 = arith.mulf %194, %193 : vector<16x32xf32>
      %196 = arith.addf %191, %195 : vector<16x32xf32>
      %cst_81 = arith.constant 0.797884583 : f32
      %197 = vector.broadcast %cst_81 : f32 to vector<16x32xf32>
      %198 = arith.mulf %197, %196 : vector<16x32xf32>
      %199 = math.tanh %198 : vector<16x32xf32>
      %cst_82 = arith.constant 1.000000e+00 : f32
      %200 = vector.broadcast %cst_82 : f32 to vector<16x32xf32>
      %201 = arith.addf %200, %199 : vector<16x32xf32>
      %cst_83 = arith.constant 5.000000e-01 : f32
      %202 = vector.broadcast %cst_83 : f32 to vector<16x32xf32>
      %203 = arith.mulf %202, %201 : vector<16x32xf32>
      %204 = arith.mulf %191, %203 : vector<16x32xf32>
      %205 = arith.mulf %204, %204 : vector<16x32xf32>
      %206 = vector.shape_cast %205 : vector<16x32xf32> to vector<1x16x32xf32>
      %cst_84 = arith.constant dense<0.000000e+00> : vector<1xf32>
      %207 = vector.multi_reduction <add>, %206, %cst_84 [1, 2] : vector<1x16x32xf32> to vector<1xf32>
      %208 = vector.shape_cast %207 : vector<1xf32> to vector<1x1x1xf32>
      %209 = vector.extract %208[0, 0, 0] : f32 from vector<1x1x1xf32>
      %210 = vector.broadcast %209 : f32 to vector<8x128xf32>
      %c0_85 = arith.constant 0 : index
      %c0_86 = arith.constant 0 : index
      %c0_87 = arith.constant 0 : index
      %211 = vector.load %arg28[%c0_85, %c0_86, %c0_87] : memref<1x8x128xf32, #tpu.memory_space<vmem>>, vector<1x8x128xf32>
      %212 = vector.shape_cast %211 : vector<1x8x128xf32> to vector<8x128xf32>
      %213 = vector.shape_cast %210 : vector<8x128xf32> to vector<1x8x128xf32>
      tpu.vector_store %arg28[%c0_85, %c0_86, %c0_87], %213 {strides = array<i32>} : memref<1x8x128xf32, #tpu.memory_space<vmem>>, vector<1x8x128xf32>,
      %c0_88 = arith.constant 0 : index
      %c0_89 = arith.constant 0 : index
      %214 = vector.load %arg4[%c0_88, %c0_89] : memref<1x32xf32, #tpu.memory_space<vmem>>, vector<1x32xf32>
      %c0_90 = arith.constant 0 : index
      %c0_91 = arith.constant 0 : index
      %215 = vector.load %arg5[%c0_90, %c0_91] : memref<1x32xf32, #tpu.memory_space<vmem>>, vector<1x32xf32>
      %cst_92 = arith.constant dense<0.000000e+00> : vector<16xf32>
      %216 = vector.multi_reduction <add>, %204, %cst_92 [1] : vector<16x32xf32> to vector<16xf32>
      %217 = vector.shape_cast %216 : vector<16xf32> to vector<16x1xf32>
      %cst_93 = arith.constant 3.200000e+01 : f32
      %218 = vector.broadcast %cst_93 : f32 to vector<16x1xf32>
      %219 = arith.divf %217, %218 : vector<16x1xf32>
      %220 = vector.broadcast %219 : vector<16x1xf32> to vector<16x32xf32>
      %221 = arith.subf %204, %220 : vector<16x32xf32>
      %222 = arith.mulf %221, %221 : vector<16x32xf32>
      %cst_94 = arith.constant dense<0.000000e+00> : vector<16xf32>
      %223 = vector.multi_reduction <add>, %222, %cst_94 [1] : vector<16x32xf32> to vector<16xf32>
      %224 = vector.shape_cast %223 : vector<16xf32> to vector<16x1xf32>
      %cst_95 = arith.constant 3.200000e+01 : f32
      %225 = vector.broadcast %cst_95 : f32 to vector<16x1xf32>
      %226 = arith.divf %224, %225 : vector<16x1xf32>
      %227 = vector.broadcast %219 : vector<16x1xf32> to vector<16x32xf32>
      %228 = arith.subf %204, %227 : vector<16x32xf32>
      %cst_96 = arith.constant 9.99999974E-6 : f32
      %229 = vector.broadcast %cst_96 : f32 to vector<16x1xf32>
      %230 = arith.addf %226, %229 : vector<16x1xf32>
      %231 = math.rsqrt %230 : vector<16x1xf32>
      %232 = vector.broadcast %231 : vector<16x1xf32> to vector<16x32xf32>
      %233 = arith.mulf %228, %232 : vector<16x32xf32>
      %234 = vector.broadcast %214 : vector<1x32xf32> to vector<16x32xf32>
      %235 = arith.mulf %233, %234 : vector<16x32xf32>
      %236 = vector.broadcast %215 : vector<1x32xf32> to vector<16x32xf32>
      %237 = arith.addf %235, %236 : vector<16x32xf32>
      %238 = arith.truncf %237 : vector<16x32xf32> to vector<16x32xbf16>
      %c0_97 = arith.constant 0 : index
      %c0_98 = arith.constant 0 : index
      %239 = vector.load %arg6[%c0_97, %c0_98] : memref<32x32xbf16, #tpu.memory_space<vmem>>, vector<32x32xbf16>
      %cst_99 = arith.constant dense<0.000000e+00> : vector<16x32xf32>
      %240 = tpu.matmul %238, %239, %cst_99 {dimension_numbers = #tpu.dot_dimension_numbers<[1], [0], [0], [1], [0, 0, 1, 1], [], []>} : vector<16x32xbf16>, vector<32x32xbf16>, vector<16x32xf32> -> vector<16x32xf32>
      %c0_100 = arith.constant 0 : index
      %c0_101 = arith.constant 0 : index
      %241 = vector.load %arg7[%c0_100, %c0_101] : memref<1x32xf32, #tpu.memory_space<vmem>>, vector<1x32xf32>
      %242 = vector.broadcast %241 : vector<1x32xf32> to vector<16x32xf32>
      %243 = arith.addf %240, %242 : vector<16x32xf32>
      %c0_102 = arith.constant 0 : index
      %c0_103 = arith.constant 0 : index
      %c0_104 = arith.constant 0 : index
      %244 = vector.load %arg9[%c0_102, %c0_103, %c0_104] : memref<1x16x1xf32, #tpu.memory_space<vmem>>, vector<1x16x1xf32>
      %245 = vector.shape_cast %244 : vector<1x16x1xf32> to vector<16x1xf32>
      %cst_105 = arith.constant 1.000000e+00 : f32
      %246 = vector.broadcast %cst_105 : f32 to vector<16x1xf32>
      %247 = arith.subf %246, %245 : vector<16x1xf32>
      %248 = vector.broadcast %247 : vector<16x1xf32> to vector<16x32xf32>
      %249 = arith.mulf %243, %248 : vector<16x32xf32>
      %c0_106 = arith.constant 0 : index
      %c0_107 = arith.constant 0 : index
      %250 = vector.load %arg8[%c0_106, %c0_107] : memref<1x32xf32, #tpu.memory_space<vmem>>, vector<1x32xf32>
      %251 = vector.broadcast %245 : vector<16x1xf32> to vector<16x32xf32>
      %252 = vector.broadcast %250 : vector<1x32xf32> to vector<16x32xf32>
      %253 = arith.mulf %251, %252 : vector<16x32xf32>
      %254 = arith.addf %249, %253 : vector<16x32xf32>
      %c0_108 = arith.constant 0 : index
      %c0_109 = arith.constant 0 : index
      %255 = vector.load %arg10[%c0_108, %c0_109] : memref<1x32xf32, #tpu.memory_space<vmem>>, vector<1x32xf32>
      %c0_110 = arith.constant 0 : index
      %c0_111 = arith.constant 0 : index
      %256 = vector.load %arg11[%c0_110, %c0_111] : memref<1x32xf32, #tpu.memory_space<vmem>>, vector<1x32xf32>
      %cst_112 = arith.constant dense<0.000000e+00> : vector<16xf32>
      %257 = vector.multi_reduction <add>, %254, %cst_112 [1] : vector<16x32xf32> to vector<16xf32>
      %258 = vector.shape_cast %257 : vector<16xf32> to vector<16x1xf32>
      %cst_113 = arith.constant 3.200000e+01 : f32
      %259 = vector.broadcast %cst_113 : f32 to vector<16x1xf32>
      %260 = arith.divf %258, %259 : vector<16x1xf32>
      %261 = vector.broadcast %260 : vector<16x1xf32> to vector<16x32xf32>
      %262 = arith.subf %254, %261 : vector<16x32xf32>
      %263 = arith.mulf %262, %262 : vector<16x32xf32>
      %cst_114 = arith.constant dense<0.000000e+00> : vector<16xf32>
      %264 = vector.multi_reduction <add>, %263, %cst_114 [1] : vector<16x32xf32> to vector<16xf32>
      %265 = vector.shape_cast %264 : vector<16xf32> to vector<16x1xf32>
      %cst_115 = arith.constant 3.200000e+01 : f32
      %266 = vector.broadcast %cst_115 : f32 to vector<16x1xf32>
      %267 = arith.divf %265, %266 : vector<16x1xf32>
      %268 = vector.broadcast %260 : vector<16x1xf32> to vector<16x32xf32>
      %269 = arith.subf %254, %268 : vector<16x32xf32>
      %cst_116 = arith.constant 9.99999974E-6 : f32
      %270 = vector.broadcast %cst_116 : f32 to vector<16x1xf32>
      %271 = arith.addf %267, %270 : vector<16x1xf32>
      %272 = math.rsqrt %271 : vector<16x1xf32>
      %273 = vector.broadcast %272 : vector<16x1xf32> to vector<16x32xf32>
      %274 = arith.mulf %269, %273 : vector<16x32xf32>
      %275 = vector.broadcast %255 : vector<1x32xf32> to vector<16x32xf32>
      %276 = arith.mulf %274, %275 : vector<16x32xf32>
      %277 = vector.broadcast %256 : vector<1x32xf32> to vector<16x32xf32>
      %278 = arith.addf %276, %277 : vector<16x32xf32>
      %c0_117 = arith.constant 0 : index
      %c0_118 = arith.constant 0 : index
      %279 = vector.load %arg30[%c0_117, %c0_118] : memref<16x32xf32, #tpu.memory_space<vmem>>, vector<16x32xf32>
      tpu.vector_store %arg30[%c0_117, %c0_118], %278 {strides = array<i32>} : memref<16x32xf32, #tpu.memory_space<vmem>>, vector<16x32xf32>,
    } else {
    }
    %c0 = arith.constant 0 : index
    %c0_1 = arith.constant 0 : index
    %3 = vector.load %arg30[%c0, %c0_1] : memref<16x32xf32, #tpu.memory_space<vmem>>, vector<16x32xf32>
    %4 = arith.truncf %3 : vector<16x32xf32> to vector<16x32xbf16>
    %c0_2 = arith.constant 0 : index
    %c0_3 = arith.constant 0 : index
    %c0_4 = arith.constant 0 : index
    %5 = vector.load %arg12[%c0_2, %c0_3, %c0_4] : memref<1x32x96xbf16, #tpu.memory_space<vmem>>, vector<1x32x96xbf16>
    %6 = vector.shape_cast %5 : vector<1x32x96xbf16> to vector<32x96xbf16>
    %cst = arith.constant dense<0.000000e+00> : vector<16x96xf32>
    %7 = tpu.matmul %4, %6, %cst {dimension_numbers = #tpu.dot_dimension_numbers<[1], [0], [0], [1], [0, 0, 1, 1], [], []>} : vector<16x32xbf16>, vector<32x96xbf16>, vector<16x96xf32> -> vector<16x96xf32>
    %c0_5 = arith.constant 0 : index
    %c0_6 = arith.constant 0 : index
    %c0_7 = arith.constant 0 : index
    %8 = vector.load %arg13[%c0_5, %c0_6, %c0_7] : memref<1x1x96xf32, #tpu.memory_space<vmem>>, vector<1x1x96xf32>
    %9 = vector.shape_cast %8 : vector<1x1x96xf32> to vector<1x96xf32>
    %10 = vector.broadcast %9 : vector<1x96xf32> to vector<16x96xf32>
    %11 = arith.addf %7, %10 : vector<16x96xf32>
    %12 = vector.extract_strided_slice %11 {offsets = [0, 0], sizes = [16, 32], strides = [1, 1]} : vector<16x96xf32> to vector<16x32xf32>
    %13 = vector.extract_strided_slice %11 {offsets = [0, 32], sizes = [16, 32], strides = [1, 1]} : vector<16x96xf32> to vector<16x32xf32>
    %14 = vector.extract_strided_slice %11 {offsets = [0, 64], sizes = [16, 32], strides = [1, 1]} : vector<16x96xf32> to vector<16x32xf32>
    %15 = vector.extract_strided_slice %12 {offsets = [0, 0], sizes = [16, 8], strides = [1, 1]} : vector<16x32xf32> to vector<16x8xf32>
    %16 = arith.truncf %15 : vector<16x8xf32> to vector<16x8xbf16>
    %17 = vector.extract_strided_slice %13 {offsets = [0, 0], sizes = [16, 8], strides = [1, 1]} : vector<16x32xf32> to vector<16x8xf32>
    %18 = arith.truncf %17 : vector<16x8xf32> to vector<16x8xbf16>
    "tpu.trace_start"() <{level = 10 : i32, message = "td,sd->ts"}> : () -> ()
    %cst_8 = arith.constant dense<0.000000e+00> : vector<16x16xf32>
    %19 = tpu.matmul %16, %18, %cst_8 {dimension_numbers = #tpu.dot_dimension_numbers<[1], [1], [0], [0], [0, 0, 1, 0], [], []>} : vector<16x8xbf16>, vector<16x8xbf16>, vector<16x16xf32> -> vector<16x16xf32>
    "tpu.trace_stop"() : () -> ()
    %cst_9 = arith.constant dense<0xFF800000> : vector<16xf32>
    %20 = vector.multi_reduction <maximumf>, %19, %cst_9 [1] : vector<16x16xf32> to vector<16xf32>
    %21 = vector.shape_cast %20 : vector<16xf32> to vector<16x1xf32>
    %22 = vector.broadcast %21 : vector<16x1xf32> to vector<16x16xf32>
    %23 = arith.subf %19, %22 : vector<16x16xf32>
    %24 = math.exp %23 : vector<16x16xf32>
    %cst_10 = arith.constant dense<0.000000e+00> : vector<16xf32>
    %25 = vector.multi_reduction <add>, %24, %cst_10 [1] : vector<16x16xf32> to vector<16xf32>
    %26 = vector.shape_cast %25 : vector<16xf32> to vector<16x1xf32>
    %27 = tpu.reciprocal %26 {approx = true} : vector<16x1xf32> -> vector<16x1xf32>
    %28 = vector.broadcast %27 : vector<16x1xf32> to vector<16x16xf32>
    %29 = arith.mulf %24, %28 : vector<16x16xf32>
    %30 = arith.truncf %29 : vector<16x16xf32> to vector<16x16xbf16>
    %31 = vector.extract_strided_slice %14 {offsets = [0, 0], sizes = [16, 8], strides = [1, 1]} : vector<16x32xf32> to vector<16x8xf32>
    %32 = arith.truncf %31 : vector<16x8xf32> to vector<16x8xbf16>
    %cst_11 = arith.constant dense<0.000000e+00> : vector<16x8xf32>
    %33 = tpu.matmul %30, %32, %cst_11 {dimension_numbers = #tpu.dot_dimension_numbers<[1], [0], [0], [1], [0, 0, 1, 1], [], []>} : vector<16x16xbf16>, vector<16x8xbf16>, vector<16x8xf32> -> vector<16x8xf32>
    %34 = vector.extract_strided_slice %12 {offsets = [0, 8], sizes = [16, 8], strides = [1, 1]} : vector<16x32xf32> to vector<16x8xf32>
    %35 = arith.truncf %34 : vector<16x8xf32> to vector<16x8xbf16>
    %36 = vector.extract_strided_slice %13 {offsets = [0, 8], sizes = [16, 8], strides = [1, 1]} : vector<16x32xf32> to vector<16x8xf32>
    %37 = arith.truncf %36 : vector<16x8xf32> to vector<16x8xbf16>
    "tpu.trace_start"() <{level = 10 : i32, message = "td,sd->ts"}> : () -> ()
    %cst_12 = arith.constant dense<0.000000e+00> : vector<16x16xf32>
    %38 = tpu.matmul %35, %37, %cst_12 {dimension_numbers = #tpu.dot_dimension_numbers<[1], [1], [0], [0], [0, 0, 1, 0], [], []>} : vector<16x8xbf16>, vector<16x8xbf16>, vector<16x16xf32> -> vector<16x16xf32>
    "tpu.trace_stop"() : () -> ()
    %cst_13 = arith.constant dense<0xFF800000> : vector<16xf32>
    %39 = vector.multi_reduction <maximumf>, %38, %cst_13 [1] : vector<16x16xf32> to vector<16xf32>
    %40 = vector.shape_cast %39 : vector<16xf32> to vector<16x1xf32>
    %41 = vector.broadcast %40 : vector<16x1xf32> to vector<16x16xf32>
    %42 = arith.subf %38, %41 : vector<16x16xf32>
    %43 = math.exp %42 : vector<16x16xf32>
    %cst_14 = arith.constant dense<0.000000e+00> : vector<16xf32>
    %44 = vector.multi_reduction <add>, %43, %cst_14 [1] : vector<16x16xf32> to vector<16xf32>
    %45 = vector.shape_cast %44 : vector<16xf32> to vector<16x1xf32>
    %46 = tpu.reciprocal %45 {approx = true} : vector<16x1xf32> -> vector<16x1xf32>
    %47 = vector.broadcast %46 : vector<16x1xf32> to vector<16x16xf32>
    %48 = arith.mulf %43, %47 : vector<16x16xf32>
    %49 = arith.truncf %48 : vector<16x16xf32> to vector<16x16xbf16>
    %50 = vector.extract_strided_slice %14 {offsets = [0, 8], sizes = [16, 8], strides = [1, 1]} : vector<16x32xf32> to vector<16x8xf32>
    %51 = arith.truncf %50 : vector<16x8xf32> to vector<16x8xbf16>
    %cst_15 = arith.constant dense<0.000000e+00> : vector<16x8xf32>
    %52 = tpu.matmul %49, %51, %cst_15 {dimension_numbers = #tpu.dot_dimension_numbers<[1], [0], [0], [1], [0, 0, 1, 1], [], []>} : vector<16x16xbf16>, vector<16x8xbf16>, vector<16x8xf32> -> vector<16x8xf32>
    %53 = vector.extract_strided_slice %12 {offsets = [0, 16], sizes = [16, 8], strides = [1, 1]} : vector<16x32xf32> to vector<16x8xf32>
    %54 = arith.truncf %53 : vector<16x8xf32> to vector<16x8xbf16>
    %55 = vector.extract_strided_slice %13 {offsets = [0, 16], sizes = [16, 8], strides = [1, 1]} : vector<16x32xf32> to vector<16x8xf32>
    %56 = arith.truncf %55 : vector<16x8xf32> to vector<16x8xbf16>
    "tpu.trace_start"() <{level = 10 : i32, message = "td,sd->ts"}> : () -> ()
    %cst_16 = arith.constant dense<0.000000e+00> : vector<16x16xf32>
    %57 = tpu.matmul %54, %56, %cst_16 {dimension_numbers = #tpu.dot_dimension_numbers<[1], [1], [0], [0], [0, 0, 1, 0], [], []>} : vector<16x8xbf16>, vector<16x8xbf16>, vector<16x16xf32> -> vector<16x16xf32>
    "tpu.trace_stop"() : () -> ()
    %cst_17 = arith.constant dense<0xFF800000> : vector<16xf32>
    %58 = vector.multi_reduction <maximumf>, %57, %cst_17 [1] : vector<16x16xf32> to vector<16xf32>
    %59 = vector.shape_cast %58 : vector<16xf32> to vector<16x1xf32>
    %60 = vector.broadcast %59 : vector<16x1xf32> to vector<16x16xf32>
    %61 = arith.subf %57, %60 : vector<16x16xf32>
    %62 = math.exp %61 : vector<16x16xf32>
    %cst_18 = arith.constant dense<0.000000e+00> : vector<16xf32>
    %63 = vector.multi_reduction <add>, %62, %cst_18 [1] : vector<16x16xf32> to vector<16xf32>
    %64 = vector.shape_cast %63 : vector<16xf32> to vector<16x1xf32>
    %65 = tpu.reciprocal %64 {approx = true} : vector<16x1xf32> -> vector<16x1xf32>
    %66 = vector.broadcast %65 : vector<16x1xf32> to vector<16x16xf32>
    %67 = arith.mulf %62, %66 : vector<16x16xf32>
    %68 = arith.truncf %67 : vector<16x16xf32> to vector<16x16xbf16>
    %69 = vector.extract_strided_slice %14 {offsets = [0, 16], sizes = [16, 8], strides = [1, 1]} : vector<16x32xf32> to vector<16x8xf32>
    %70 = arith.truncf %69 : vector<16x8xf32> to vector<16x8xbf16>
    %cst_19 = arith.constant dense<0.000000e+00> : vector<16x8xf32>
    %71 = tpu.matmul %68, %70, %cst_19 {dimension_numbers = #tpu.dot_dimension_numbers<[1], [0], [0], [1], [0, 0, 1, 1], [], []>} : vector<16x16xbf16>, vector<16x8xbf16>, vector<16x8xf32> -> vector<16x8xf32>
    %72 = vector.extract_strided_slice %12 {offsets = [0, 24], sizes = [16, 8], strides = [1, 1]} : vector<16x32xf32> to vector<16x8xf32>
    %73 = arith.truncf %72 : vector<16x8xf32> to vector<16x8xbf16>
    %74 = vector.extract_strided_slice %13 {offsets = [0, 24], sizes = [16, 8], strides = [1, 1]} : vector<16x32xf32> to vector<16x8xf32>
    %75 = arith.truncf %74 : vector<16x8xf32> to vector<16x8xbf16>
    "tpu.trace_start"() <{level = 10 : i32, message = "td,sd->ts"}> : () -> ()
    %cst_20 = arith.constant dense<0.000000e+00> : vector<16x16xf32>
    %76 = tpu.matmul %73, %75, %cst_20 {dimension_numbers = #tpu.dot_dimension_numbers<[1], [1], [0], [0], [0, 0, 1, 0], [], []>} : vector<16x8xbf16>, vector<16x8xbf16>, vector<16x16xf32> -> vector<16x16xf32>
    "tpu.trace_stop"() : () -> ()
    %cst_21 = arith.constant dense<0xFF800000> : vector<16xf32>
    %77 = vector.multi_reduction <maximumf>, %76, %cst_21 [1] : vector<16x16xf32> to vector<16xf32>
    %78 = vector.shape_cast %77 : vector<16xf32> to vector<16x1xf32>
    %79 = vector.broadcast %78 : vector<16x1xf32> to vector<16x16xf32>
    %80 = arith.subf %76, %79 : vector<16x16xf32>
    %81 = math.exp %80 : vector<16x16xf32>
    %cst_22 = arith.constant dense<0.000000e+00> : vector<16xf32>
    %82 = vector.multi_reduction <add>, %81, %cst_22 [1] : vector<16x16xf32> to vector<16xf32>
    %83 = vector.shape_cast %82 : vector<16xf32> to vector<16x1xf32>
    %84 = tpu.reciprocal %83 {approx = true} : vector<16x1xf32> -> vector<16x1xf32>
    %85 = vector.broadcast %84 : vector<16x1xf32> to vector<16x16xf32>
    %86 = arith.mulf %81, %85 : vector<16x16xf32>
    %87 = arith.truncf %86 : vector<16x16xf32> to vector<16x16xbf16>
    %88 = vector.extract_strided_slice %14 {offsets = [0, 24], sizes = [16, 8], strides = [1, 1]} : vector<16x32xf32> to vector<16x8xf32>
    %89 = arith.truncf %88 : vector<16x8xf32> to vector<16x8xbf16>
    %cst_23 = arith.constant dense<0.000000e+00> : vector<16x8xf32>
    %90 = tpu.matmul %87, %89, %cst_23 {dimension_numbers = #tpu.dot_dimension_numbers<[1], [0], [0], [1], [0, 0, 1, 1], [], []>} : vector<16x16xbf16>, vector<16x8xbf16>, vector<16x8xf32> -> vector<16x8xf32>
    %91 = tpu.concatenate %33, %52, %71, %90 in 1 : vector<16x8xf32>, vector<16x8xf32>, vector<16x8xf32>, vector<16x8xf32> -> vector<16x32xf32>
    %92 = arith.truncf %91 : vector<16x32xf32> to vector<16x32xbf16>
    %c0_24 = arith.constant 0 : index
    %c0_25 = arith.constant 0 : index
    %c0_26 = arith.constant 0 : index
    %93 = vector.load %arg14[%c0_24, %c0_25, %c0_26] : memref<1x32x32xbf16, #tpu.memory_space<vmem>>, vector<1x32x32xbf16>
    %94 = vector.shape_cast %93 : vector<1x32x32xbf16> to vector<32x32xbf16>
    %cst_27 = arith.constant dense<0.000000e+00> : vector<16x32xf32>
    %95 = tpu.matmul %92, %94, %cst_27 {dimension_numbers = #tpu.dot_dimension_numbers<[1], [0], [0], [1], [0, 0, 1, 1], [], []>} : vector<16x32xbf16>, vector<32x32xbf16>, vector<16x32xf32> -> vector<16x32xf32>
    %c0_28 = arith.constant 0 : index
    %c0_29 = arith.constant 0 : index
    %c0_30 = arith.constant 0 : index
    %96 = vector.load %arg15[%c0_28, %c0_29, %c0_30] : memref<1x1x32xf32, #tpu.memory_space<vmem>>, vector<1x1x32xf32>
    %97 = vector.shape_cast %96 : vector<1x1x32xf32> to vector<1x32xf32>
    %98 = vector.broadcast %97 : vector<1x32xf32> to vector<16x32xf32>
    %99 = arith.addf %95, %98 : vector<16x32xf32>
    %100 = arith.addf %3, %99 : vector<16x32xf32>
    %c0_31 = arith.constant 0 : index
    %c0_32 = arith.constant 0 : index
    %c0_33 = arith.constant 0 : index
    %101 = vector.load %arg16[%c0_31, %c0_32, %c0_33] : memref<1x1x32xf32, #tpu.memory_space<vmem>>, vector<1x1x32xf32>
    %102 = vector.shape_cast %101 : vector<1x1x32xf32> to vector<1x32xf32>
    %c0_34 = arith.constant 0 : index
    %c0_35 = arith.constant 0 : index
    %c0_36 = arith.constant 0 : index
    %103 = vector.load %arg17[%c0_34, %c0_35, %c0_36] : memref<1x1x32xf32, #tpu.memory_space<vmem>>, vector<1x1x32xf32>
    %104 = vector.shape_cast %103 : vector<1x1x32xf32> to vector<1x32xf32>
    %cst_37 = arith.constant dense<0.000000e+00> : vector<16xf32>
    %105 = vector.multi_reduction <add>, %100, %cst_37 [1] : vector<16x32xf32> to vector<16xf32>
    %106 = vector.shape_cast %105 : vector<16xf32> to vector<16x1xf32>
    %cst_38 = arith.constant 3.200000e+01 : f32
    %107 = vector.broadcast %cst_38 : f32 to vector<16x1xf32>
    %108 = arith.divf %106, %107 : vector<16x1xf32>
    %109 = vector.broadcast %108 : vector<16x1xf32> to vector<16x32xf32>
    %110 = arith.subf %100, %109 : vector<16x32xf32>
    %111 = arith.mulf %110, %110 : vector<16x32xf32>
    %cst_39 = arith.constant dense<0.000000e+00> : vector<16xf32>
    %112 = vector.multi_reduction <add>, %111, %cst_39 [1] : vector<16x32xf32> to vector<16xf32>
    %113 = vector.shape_cast %112 : vector<16xf32> to vector<16x1xf32>
    %cst_40 = arith.constant 3.200000e+01 : f32
    %114 = vector.broadcast %cst_40 : f32 to vector<16x1xf32>
    %115 = arith.divf %113, %114 : vector<16x1xf32>
    %116 = vector.broadcast %108 : vector<16x1xf32> to vector<16x32xf32>
    %117 = arith.subf %100, %116 : vector<16x32xf32>
    %cst_41 = arith.constant 9.99999974E-6 : f32
    %118 = vector.broadcast %cst_41 : f32 to vector<16x1xf32>
    %119 = arith.addf %115, %118 : vector<16x1xf32>
    %120 = math.rsqrt %119 : vector<16x1xf32>
    %121 = vector.broadcast %120 : vector<16x1xf32> to vector<16x32xf32>
    %122 = arith.mulf %117, %121 : vector<16x32xf32>
    %123 = vector.broadcast %102 : vector<1x32xf32> to vector<16x32xf32>
    %124 = arith.mulf %122, %123 : vector<16x32xf32>
    %125 = vector.broadcast %104 : vector<1x32xf32> to vector<16x32xf32>
    %126 = arith.addf %124, %125 : vector<16x32xf32>
    %127 = arith.truncf %126 : vector<16x32xf32> to vector<16x32xbf16>
    %c0_42 = arith.constant 0 : index
    %c0_43 = arith.constant 0 : index
    %c0_44 = arith.constant 0 : index
    %128 = vector.load %arg18[%c0_42, %c0_43, %c0_44] : memref<1x32x64xbf16, #tpu.memory_space<vmem>>, vector<1x32x64xbf16>
    %129 = vector.shape_cast %128 : vector<1x32x64xbf16> to vector<32x64xbf16>
    %cst_45 = arith.constant dense<0.000000e+00> : vector<16x64xf32>
    %130 = tpu.matmul %127, %129, %cst_45 {dimension_numbers = #tpu.dot_dimension_numbers<[1], [0], [0], [1], [0, 0, 1, 1], [], []>} : vector<16x32xbf16>, vector<32x64xbf16>, vector<16x64xf32> -> vector<16x64xf32>
    %c0_46 = arith.constant 0 : index
    %c0_47 = arith.constant 0 : index
    %c0_48 = arith.constant 0 : index
    %131 = vector.load %arg19[%c0_46, %c0_47, %c0_48] : memref<1x1x64xf32, #tpu.memory_space<vmem>>, vector<1x1x64xf32>
    %132 = vector.shape_cast %131 : vector<1x1x64xf32> to vector<1x64xf32>
    %133 = vector.broadcast %132 : vector<1x64xf32> to vector<16x64xf32>
    %134 = arith.addf %130, %133 : vector<16x64xf32>
    %135 = arith.mulf %134, %134 : vector<16x64xf32>
    %136 = arith.mulf %134, %135 : vector<16x64xf32>
    %cst_49 = arith.constant 4.471500e-02 : f32
    %137 = vector.broadcast %cst_49 : f32 to vector<16x64xf32>
    %138 = arith.mulf %137, %136 : vector<16x64xf32>
    %139 = arith.addf %134, %138 : vector<16x64xf32>
    %cst_50 = arith.constant 0.797884583 : f32
    %140 = vector.broadcast %cst_50 : f32 to vector<16x64xf32>
    %141 = arith.mulf %140, %139 : vector<16x64xf32>
    %142 = math.tanh %141 : vector<16x64xf32>
    %cst_51 = arith.constant 1.000000e+00 : f32
    %143 = vector.broadcast %cst_51 : f32 to vector<16x64xf32>
    %144 = arith.addf %143, %142 : vector<16x64xf32>
    %cst_52 = arith.constant 5.000000e-01 : f32
    %145 = vector.broadcast %cst_52 : f32 to vector<16x64xf32>
    %146 = arith.mulf %145, %144 : vector<16x64xf32>
    %147 = arith.mulf %134, %146 : vector<16x64xf32>
    %148 = arith.truncf %147 : vector<16x64xf32> to vector<16x64xbf16>
    %c0_53 = arith.constant 0 : index
    %c0_54 = arith.constant 0 : index
    %c0_55 = arith.constant 0 : index
    %149 = vector.load %arg20[%c0_53, %c0_54, %c0_55] : memref<1x64x32xbf16, #tpu.memory_space<vmem>>, vector<1x64x32xbf16>
    %150 = vector.shape_cast %149 : vector<1x64x32xbf16> to vector<64x32xbf16>
    %cst_56 = arith.constant dense<0.000000e+00> : vector<16x32xf32>
    %151 = tpu.matmul %148, %150, %cst_56 {dimension_numbers = #tpu.dot_dimension_numbers<[1], [0], [0], [1], [0, 0, 1, 1], [], []>} : vector<16x64xbf16>, vector<64x32xbf16>, vector<16x32xf32> -> vector<16x32xf32>
    %c0_57 = arith.constant 0 : index
    %c0_58 = arith.constant 0 : index
    %c0_59 = arith.constant 0 : index
    %152 = vector.load %arg21[%c0_57, %c0_58, %c0_59] : memref<1x1x32xf32, #tpu.memory_space<vmem>>, vector<1x1x32xf32>
    %153 = vector.shape_cast %152 : vector<1x1x32xf32> to vector<1x32xf32>
    %154 = vector.broadcast %153 : vector<1x32xf32> to vector<16x32xf32>
    %155 = arith.addf %151, %154 : vector<16x32xf32>
    %156 = arith.addf %126, %155 : vector<16x32xf32>
    %c0_60 = arith.constant 0 : index
    %c0_61 = arith.constant 0 : index
    %c0_62 = arith.constant 0 : index
    %157 = vector.load %arg22[%c0_60, %c0_61, %c0_62] : memref<1x1x32xf32, #tpu.memory_space<vmem>>, vector<1x1x32xf32>
    %158 = vector.shape_cast %157 : vector<1x1x32xf32> to vector<1x32xf32>
    %c0_63 = arith.constant 0 : index
    %c0_64 = arith.constant 0 : index
    %c0_65 = arith.constant 0 : index
    %159 = vector.load %arg23[%c0_63, %c0_64, %c0_65] : memref<1x1x32xf32, #tpu.memory_space<vmem>>, vector<1x1x32xf32>
    %160 = vector.shape_cast %159 : vector<1x1x32xf32> to vector<1x32xf32>
    %cst_66 = arith.constant dense<0.000000e+00> : vector<16xf32>
    %161 = vector.multi_reduction <add>, %156, %cst_66 [1] : vector<16x32xf32> to vector<16xf32>
    %162 = vector.shape_cast %161 : vector<16xf32> to vector<16x1xf32>
    %cst_67 = arith.constant 3.200000e+01 : f32
    %163 = vector.broadcast %cst_67 : f32 to vector<16x1xf32>
    %164 = arith.divf %162, %163 : vector<16x1xf32>
    %165 = vector.broadcast %164 : vector<16x1xf32> to vector<16x32xf32>
    %166 = arith.subf %156, %165 : vector<16x32xf32>
    %167 = arith.mulf %166, %166 : vector<16x32xf32>
    %cst_68 = arith.constant dense<0.000000e+00> : vector<16xf32>
    %168 = vector.multi_reduction <add>, %167, %cst_68 [1] : vector<16x32xf32> to vector<16xf32>
    %169 = vector.shape_cast %168 : vector<16xf32> to vector<16x1xf32>
    %cst_69 = arith.constant 3.200000e+01 : f32
    %170 = vector.broadcast %cst_69 : f32 to vector<16x1xf32>
    %171 = arith.divf %169, %170 : vector<16x1xf32>
    %172 = vector.broadcast %164 : vector<16x1xf32> to vector<16x32xf32>
    %173 = arith.subf %156, %172 : vector<16x32xf32>
    %cst_70 = arith.constant 9.99999974E-6 : f32
    %174 = vector.broadcast %cst_70 : f32 to vector<16x1xf32>
    %175 = arith.addf %171, %174 : vector<16x1xf32>
    %176 = math.rsqrt %175 : vector<16x1xf32>
    %177 = vector.broadcast %176 : vector<16x1xf32> to vector<16x32xf32>
    %178 = arith.mulf %173, %177 : vector<16x32xf32>
    %179 = vector.broadcast %158 : vector<1x32xf32> to vector<16x32xf32>
    %180 = arith.mulf %178, %179 : vector<16x32xf32>
    %181 = vector.broadcast %160 : vector<1x32xf32> to vector<16x32xf32>
    %182 = arith.addf %180, %181 : vector<16x32xf32>
    %c0_71 = arith.constant 0 : index
    %c0_72 = arith.constant 0 : index
    %183 = vector.load %arg30[%c0_71, %c0_72] : memref<16x32xf32, #tpu.memory_space<vmem>>, vector<16x32xf32>
    tpu.vector_store %arg30[%c0_71, %c0_72], %182 {strides = array<i32>} : memref<16x32xf32, #tpu.memory_space<vmem>>, vector<16x32xf32>,
    %c1_i32 = arith.constant 1 : i32
    %184 = arith.cmpi eq, %arg1, %c1_i32 : i32
    %185 = arith.extui %184 : i1 to i32
    %c0_i32_73 = arith.constant 0 : i32
    %186 = arith.cmpi ne, %185, %c0_i32_73 : i32
    scf.if %186 {
      %c0_74 = arith.constant 0 : index
      %c0_75 = arith.constant 0 : index
      %187 = vector.load %arg30[%c0_74, %c0_75] : memref<16x32xf32, #tpu.memory_space<vmem>>, vector<16x32xf32>
      %188 = arith.truncf %187 : vector<16x32xf32> to vector<16x32xbf16>
      %c0_76 = arith.constant 0 : index
      %c0_77 = arith.constant 0 : index
      %189 = vector.load %arg24[%c0_76, %c0_77] : memref<32x16xbf16, #tpu.memory_space<vmem>>, vector<32x16xbf16>
      %cst_78 = arith.constant dense<0.000000e+00> : vector<16x16xf32>
      %190 = tpu.matmul %188, %189, %cst_78 {dimension_numbers = #tpu.dot_dimension_numbers<[1], [0], [0], [1], [0, 0, 1, 1], [], []>} : vector<16x32xbf16>, vector<32x16xbf16>, vector<16x16xf32> -> vector<16x16xf32>
      %c0_79 = arith.constant 0 : index
      %c0_80 = arith.constant 0 : index
      %191 = vector.load %arg25[%c0_79, %c0_80] : memref<1x16xf32, #tpu.memory_space<vmem>>, vector<1x16xf32>
      %192 = vector.broadcast %191 : vector<1x16xf32> to vector<16x16xf32>
      %193 = arith.addf %190, %192 : vector<16x16xf32>
      %194 = arith.mulf %193, %193 : vector<16x16xf32>
      %cst_81 = arith.constant dense<0.000000e+00> : vector<16xf32>
      %195 = vector.multi_reduction <add>, %194, %cst_81 [1] : vector<16x16xf32> to vector<16xf32>
      %196 = vector.shape_cast %195 : vector<16xf32> to vector<16x1xf32>
      %cst_82 = arith.constant 9.99999996E-13 : f32
      %197 = vector.broadcast %cst_82 : f32 to vector<16x1xf32>
      %198 = arith.addf %196, %197 : vector<16x1xf32>
      %199 = math.rsqrt %198 : vector<16x1xf32>
      %200 = vector.broadcast %199 : vector<16x1xf32> to vector<16x16xf32>
      %201 = arith.mulf %193, %200 : vector<16x16xf32>
      %c0_83 = arith.constant 0 : index
      %c0_84 = arith.constant 0 : index
      %202 = vector.load %arg26[%c0_83, %c0_84] : memref<8x16xf32, #tpu.memory_space<vmem>>, vector<8x16xf32>
      %203 = arith.mulf %202, %202 : vector<8x16xf32>
      %cst_85 = arith.constant dense<0.000000e+00> : vector<8xf32>
      %204 = vector.multi_reduction <add>, %203, %cst_85 [1] : vector<8x16xf32> to vector<8xf32>
      %205 = vector.shape_cast %204 : vector<8xf32> to vector<8x1xf32>
      %cst_86 = arith.constant 9.99999996E-13 : f32
      %206 = vector.broadcast %cst_86 : f32 to vector<8x1xf32>
      %207 = arith.addf %205, %206 : vector<8x1xf32>
      %208 = math.rsqrt %207 : vector<8x1xf32>
      %209 = vector.broadcast %208 : vector<8x1xf32> to vector<8x16xf32>
      %210 = arith.mulf %202, %209 : vector<8x16xf32>
      "tpu.trace_start"() <{level = 10 : i32, message = "tf,cf->tc"}> : () -> ()
      %cst_87 = arith.constant dense<0.000000e+00> : vector<16x8xf32>
      %211 = tpu.matmul %201, %210, %cst_87 {dimension_numbers = #tpu.dot_dimension_numbers<[1], [1], [0], [0], [0, 0, 1, 0], [], []>} : vector<16x16xf32>, vector<8x16xf32>, vector<16x8xf32> -> vector<16x8xf32>
      "tpu.trace_stop"() : () -> ()
      %cst_88 = arith.constant 1.000000e+01 : f32
      %212 = vector.broadcast %cst_88 : f32 to vector<16x8xf32>
      %213 = arith.mulf %211, %212 : vector<16x8xf32>
      %cst_89 = arith.constant dense<0xFF800000> : vector<16xf32>
      %214 = vector.multi_reduction <maximumf>, %213, %cst_89 [1] : vector<16x8xf32> to vector<16xf32>
      %215 = vector.shape_cast %214 : vector<16xf32> to vector<16x1xf32>
      %216 = vector.broadcast %215 : vector<16x1xf32> to vector<16x8xf32>
      %217 = arith.subf %213, %216 : vector<16x8xf32>
      %218 = math.exp %217 : vector<16x8xf32>
      %cst_90 = arith.constant dense<0.000000e+00> : vector<16xf32>
      %219 = vector.multi_reduction <add>, %218, %cst_90 [1] : vector<16x8xf32> to vector<16xf32>
      %220 = vector.shape_cast %219 : vector<16xf32> to vector<16x1xf32>
      %221 = math.log %220 : vector<16x1xf32>
      %222 = arith.addf %221, %215 : vector<16x1xf32>
      %223 = tpu.iota {dimensions = array<i32: 1>} : vector<16x8xi32>
      %c0_91 = arith.constant 0 : index
      %c0_92 = arith.constant 0 : index
      %c0_93 = arith.constant 0 : index
      %224 = vector.load %arg27[%c0_91, %c0_92, %c0_93] : memref<1x16x1xi32, #tpu.memory_space<vmem>>, vector<1x16x1xi32>
      %225 = vector.shape_cast %224 : vector<1x16x1xi32> to vector<16x1xi32>
      %226 = vector.broadcast %225 : vector<16x1xi32> to vector<16x8xi32>
      %227 = arith.cmpi eq, %223, %226 : vector<16x8xi32>
      %cst_94 = arith.constant 0.000000e+00 : f32
      %228 = vector.broadcast %cst_94 : f32 to vector<16x8xf32>
      %229 = arith.select %227, %213, %228 : vector<16x8xi1>, vector<16x8xf32>
      %cst_95 = arith.constant dense<0.000000e+00> : vector<16xf32>
      %230 = vector.multi_reduction <add>, %229, %cst_95 [1] : vector<16x8xf32> to vector<16xf32>
      %231 = vector.shape_cast %230 : vector<16xf32> to vector<16x1xf32>
      %232 = arith.subf %222, %231 : vector<16x1xf32>
      %c0_96 = arith.constant 0 : index
      %c0_97 = arith.constant 0 : index
      %c0_98 = arith.constant 0 : index
      %233 = vector.load %arg9[%c0_96, %c0_97, %c0_98] : memref<1x16x1xf32, #tpu.memory_space<vmem>>, vector<1x16x1xf32>
      %234 = vector.shape_cast %233 : vector<1x16x1xf32> to vector<16x1xf32>
      %235 = arith.mulf %232, %234 : vector<16x1xf32>
      %236 = vector.shape_cast %235 : vector<16x1xf32> to vector<1x16x1xf32>
      %cst_99 = arith.constant dense<0.000000e+00> : vector<1xf32>
      %237 = vector.multi_reduction <add>, %236, %cst_99 [1, 2] : vector<1x16x1xf32> to vector<1xf32>
      %238 = vector.shape_cast %237 : vector<1xf32> to vector<1x1x1xf32>
      %239 = vector.extract %238[0, 0, 0] : f32 from vector<1x1x1xf32>
      %240 = vector.broadcast %239 : f32 to vector<8x128xf32>
      %c0_100 = arith.constant 0 : index
      %c0_101 = arith.constant 0 : index
      %c0_102 = arith.constant 0 : index
      %241 = vector.load %arg29[%c0_100, %c0_101, %c0_102] : memref<1x8x128xf32, #tpu.memory_space<vmem>>, vector<1x8x128xf32>
      %242 = vector.shape_cast %241 : vector<1x8x128xf32> to vector<8x128xf32>
      %243 = vector.shape_cast %240 : vector<8x128xf32> to vector<1x8x128xf32>
      tpu.vector_store %arg29[%c0_100, %c0_101, %c0_102], %243 {strides = array<i32>} : memref<1x8x128xf32, #tpu.memory_space<vmem>>, vector<1x8x128xf32>,
    } else {
    }
    return
  }
  func.func @transform_0(%arg0: i32, %arg1: i32) -> (i32, i32, i32) {
    %c0_i32 = arith.constant 0 : i32
    %c0_i32_0 = arith.constant 0 : i32
    %c0_i32_1 = arith.constant 0 : i32
    return %arg0, %c0_i32, %c0_i32_0 : i32, i32, i32
  }
  func.func @transform_1(%arg0: i32, %arg1: i32) -> (i32, i32) {
    %c0_i32 = arith.constant 0 : i32
    %c0_i32_0 = arith.constant 0 : i32
    %c0_i32_1 = arith.constant 0 : i32
    return %c0_i32, %c0_i32_0 : i32, i32
  }
  func.func @transform_2(%arg0: i32, %arg1: i32) -> (i32, i32) {
    %c0_i32 = arith.constant 0 : i32
    %c0_i32_0 = arith.constant 0 : i32
    %c0_i32_1 = arith.constant 0 : i32
    return %c0_i32, %c0_i32_0 : i32, i32
  }
  func.func @transform_3(%arg0: i32, %arg1: i32) -> (i32, i32) {
    %c0_i32 = arith.constant 0 : i32
    %c0_i32_0 = arith.constant 0 : i32
    %c0_i32_1 = arith.constant 0 : i32
    return %c0_i32, %c0_i32_0 : i32, i32
  }
  func.func @transform_4(%arg0: i32, %arg1: i32) -> (i32, i32) {
    %c0_i32 = arith.constant 0 : i32
    %c0_i32_0 = arith.constant 0 : i32
    %c0_i32_1 = arith.constant 0 : i32
    return %c0_i32, %c0_i32_0 : i32, i32
  }
  func.func @transform_5(%arg0: i32, %arg1: i32) -> (i32, i32) {
    %c0_i32 = arith.constant 0 : i32
    %c0_i32_0 = arith.constant 0 : i32
    %c0_i32_1 = arith.constant 0 : i32
    return %c0_i32, %c0_i32_0 : i32, i32
  }
  func.func @transform_6(%arg0: i32, %arg1: i32) -> (i32, i32) {
    %c0_i32 = arith.constant 0 : i32
    %c0_i32_0 = arith.constant 0 : i32
    %c0_i32_1 = arith.constant 0 : i32
    return %c0_i32, %c0_i32_0 : i32, i32
  }
  func.func @transform_7(%arg0: i32, %arg1: i32) -> (i32, i32, i32) {
    %c0_i32 = arith.constant 0 : i32
    %c0_i32_0 = arith.constant 0 : i32
    %c0_i32_1 = arith.constant 0 : i32
    return %arg0, %c0_i32, %c0_i32_0 : i32, i32, i32
  }
  func.func @transform_8(%arg0: i32, %arg1: i32) -> (i32, i32) {
    %c0_i32 = arith.constant 0 : i32
    %c0_i32_0 = arith.constant 0 : i32
    %c0_i32_1 = arith.constant 0 : i32
    return %c0_i32, %c0_i32_0 : i32, i32
  }
  func.func @transform_9(%arg0: i32, %arg1: i32) -> (i32, i32) {
    %c0_i32 = arith.constant 0 : i32
    %c0_i32_0 = arith.constant 0 : i32
    %c0_i32_1 = arith.constant 0 : i32
    return %c0_i32, %c0_i32_0 : i32, i32
  }
  func.func @transform_10(%arg0: i32, %arg1: i32) -> (i32, i32, i32) {
    %c0_i32 = arith.constant 0 : i32
    %c0_i32_0 = arith.constant 0 : i32
    %c0_i32_1 = arith.constant 0 : i32
    return %arg1, %c0_i32, %c0_i32_0 : i32, i32, i32
  }
  func.func @transform_11(%arg0: i32, %arg1: i32) -> (i32, i32, i32) {
    %c0_i32 = arith.constant 0 : i32
    %c0_i32_0 = arith.constant 0 : i32
    %c0_i32_1 = arith.constant 0 : i32
    return %arg1, %c0_i32, %c0_i32_0 : i32, i32, i32
  }
  func.func @transform_12(%arg0: i32, %arg1: i32) -> (i32, i32, i32) {
    %c0_i32 = arith.constant 0 : i32
    %c0_i32_0 = arith.constant 0 : i32
    %c0_i32_1 = arith.constant 0 : i32
    return %arg1, %c0_i32, %c0_i32_0 : i32, i32, i32
  }
  func.func @transform_13(%arg0: i32, %arg1: i32) -> (i32, i32, i32) {
    %c0_i32 = arith.constant 0 : i32
    %c0_i32_0 = arith.constant 0 : i32
    %c0_i32_1 = arith.constant 0 : i32
    return %arg1, %c0_i32, %c0_i32_0 : i32, i32, i32
  }
  func.func @transform_14(%arg0: i32, %arg1: i32) -> (i32, i32, i32) {
    %c0_i32 = arith.constant 0 : i32
    %c0_i32_0 = arith.constant 0 : i32
    %c0_i32_1 = arith.constant 0 : i32
    return %arg1, %c0_i32, %c0_i32_0 : i32, i32, i32
  }
  func.func @transform_15(%arg0: i32, %arg1: i32) -> (i32, i32, i32) {
    %c0_i32 = arith.constant 0 : i32
    %c0_i32_0 = arith.constant 0 : i32
    %c0_i32_1 = arith.constant 0 : i32
    return %arg1, %c0_i32, %c0_i32_0 : i32, i32, i32
  }
  func.func @transform_16(%arg0: i32, %arg1: i32) -> (i32, i32, i32) {
    %c0_i32 = arith.constant 0 : i32
    %c0_i32_0 = arith.constant 0 : i32
    %c0_i32_1 = arith.constant 0 : i32
    return %arg1, %c0_i32, %c0_i32_0 : i32, i32, i32
  }
  func.func @transform_17(%arg0: i32, %arg1: i32) -> (i32, i32, i32) {
    %c0_i32 = arith.constant 0 : i32
    %c0_i32_0 = arith.constant 0 : i32
    %c0_i32_1 = arith.constant 0 : i32
    return %arg1, %c0_i32, %c0_i32_0 : i32, i32, i32
  }
  func.func @transform_18(%arg0: i32, %arg1: i32) -> (i32, i32, i32) {
    %c0_i32 = arith.constant 0 : i32
    %c0_i32_0 = arith.constant 0 : i32
    %c0_i32_1 = arith.constant 0 : i32
    return %arg1, %c0_i32, %c0_i32_0 : i32, i32, i32
  }
  func.func @transform_19(%arg0: i32, %arg1: i32) -> (i32, i32, i32) {
    %c0_i32 = arith.constant 0 : i32
    %c0_i32_0 = arith.constant 0 : i32
    %c0_i32_1 = arith.constant 0 : i32
    return %arg1, %c0_i32, %c0_i32_0 : i32, i32, i32
  }
  func.func @transform_20(%arg0: i32, %arg1: i32) -> (i32, i32, i32) {
    %c0_i32 = arith.constant 0 : i32
    %c0_i32_0 = arith.constant 0 : i32
    %c0_i32_1 = arith.constant 0 : i32
    return %arg1, %c0_i32, %c0_i32_0 : i32, i32, i32
  }
  func.func @transform_21(%arg0: i32, %arg1: i32) -> (i32, i32, i32) {
    %c0_i32 = arith.constant 0 : i32
    %c0_i32_0 = arith.constant 0 : i32
    %c0_i32_1 = arith.constant 0 : i32
    return %arg1, %c0_i32, %c0_i32_0 : i32, i32, i32
  }
  func.func @transform_22(%arg0: i32, %arg1: i32) -> (i32, i32) {
    %c0_i32 = arith.constant 0 : i32
    %c0_i32_0 = arith.constant 0 : i32
    %c0_i32_1 = arith.constant 0 : i32
    return %c0_i32, %c0_i32_0 : i32, i32
  }
  func.func @transform_23(%arg0: i32, %arg1: i32) -> (i32, i32) {
    %c0_i32 = arith.constant 0 : i32
    %c0_i32_0 = arith.constant 0 : i32
    %c0_i32_1 = arith.constant 0 : i32
    return %c0_i32, %c0_i32_0 : i32, i32
  }
  func.func @transform_24(%arg0: i32, %arg1: i32) -> (i32, i32) {
    %c0_i32 = arith.constant 0 : i32
    %c0_i32_0 = arith.constant 0 : i32
    %c0_i32_1 = arith.constant 0 : i32
    return %c0_i32, %c0_i32_0 : i32, i32
  }
  func.func @transform_25(%arg0: i32, %arg1: i32) -> (i32, i32, i32) {
    %c0_i32 = arith.constant 0 : i32
    %c0_i32_0 = arith.constant 0 : i32
    %c0_i32_1 = arith.constant 0 : i32
    return %arg0, %c0_i32, %c0_i32_0 : i32, i32, i32
  }
  func.func @transform_26(%arg0: i32, %arg1: i32) -> (i32, i32, i32) {
    %c0_i32 = arith.constant 0 : i32
    %c0_i32_0 = arith.constant 0 : i32
    %c0_i32_1 = arith.constant 0 : i32
    return %arg0, %c0_i32, %c0_i32_0 : i32, i32, i32
  }
  func.func @transform_27(%arg0: i32, %arg1: i32) -> (i32, i32, i32) {
    %c0_i32 = arith.constant 0 : i32
    %c0_i32_0 = arith.constant 0 : i32
    %c0_i32_1 = arith.constant 0 : i32
    return %arg0, %c0_i32, %c0_i32_0 : i32, i32, i32
  }
}

</mosaic_0001>

<bundles_post_ra>
// kernel: hubert_pretrain_forward.2
= control target key start
LH: loop header
LB: loop body
LE: loop exit
PB: predicated region body
PF: predicated region fallthrough
CT: control target
= control target key end

     0   :  { %s559_s15 = smov 0   ;;  %s610_s0 = inlined_call_operand.vmem [shape: f32[2,34,10], index: 0, kind: input, shape index: {}]   ;;  %s611_s1 = inlined_call_operand.vmem [shape: bf16[10,16], index: 1, kind: input, shape index: {}]   ;;  %s612_s2 = inlined_call_operand.vmem [shape: f32[1,16], index: 2, kind: input, shape index: {}]   ;;  %s613_s3 = inlined_call_operand.vmem [shape: f32[1,16], index: 3, kind: input, shape index: {}]   ;;  %s614_s4 = inlined_call_operand.vmem [shape: f32[2,34,16], index: 4, kind: output, shape index: {}]  }
   0x1 LB: > { %s465_s16 = sadd.s32 4294967295, %s530_s15   ;;  %p469_p0 = scmp.ge.s32.totalorder %s530_s15, 1  ;;  %s530_s15 = sphi %s559_s15, %s14_s15  }
   0x2   : > { %p162_p1 = scmp.lt.s32.totalorder %s530_s15, 3 }
   0x4   : > { %p163_p2 = pnand %p469_p0, %p162_p1 }
   0x5   : > { %vm224_vm0 = vcmask (!%p163_p2), 1044480   ;;  %v532_v0 = vmov (!%p163_p2), 0.0   ;;  %v511_v1 = vld [vmem:[%s611_s1] sm:$0x1f] (!%p163_p2)   ;;  %p188_p3 = scmp.lt.s32.totalorder (!%p163_p2), %s465_s16, 1  ;;  %vm533_vm1 = vmmov (!%p163_p2), 0  }
   0x6   : > { %166 = sbr.rel (%p163_p2) target bundleno = 336 (0x150), region = 36  ;;  %484 = vmatprep.subr.bf16.mxu0 (!%p163_p2), %v532_v0  ;;  %498 = vmatprep.subr.bf16.mxu1 (!%p163_p2), %v532_v0  ;;  %v226_v2 = vsel (!%p163_p2), %vm224_vm0, %v511_v1, 0  ;;  %vm214_vm2 = vcmask (!%p163_p2), 80896   ;;  %vm284_vm3 = vcmask (!%p163_p2), 130048   ;;  %vm292_vm4 = vcmask (!%p163_p2), 123904  }
   0x7   : > { %486 = vmatprep.mubr.msk.bf16.mxu0 (!%p163_p2), %vm533_vm1, %v532_v0  ;;  %490 = vmatprep.mubr.msk.bf16.mxu1 (!%p163_p2), %vm533_vm1, %v532_v0 }
   0x8   : > { %485 = vmatpush3.bf16.msra.mxu0 (!%p163_p2), %v226_v2  ;;  %499 = vmatpush3.bf16.msra.mxu1 (!%p163_p2), %v226_v2 }
   0xd   : > { %s616_s16 = smov (!%p188_p3, %s465_s16), 1 }
   0xe   : > { %s500_s19 = smul.u32 40, %s616_s16 }
  0x10   : > { %s192_s22 = scalar_lea.vmem %s610_s0, %s500_s19  ;;  %s197_s29 = scalar_lea.vmem %s614_s4, %s500_s19 }
  0x11   : > { %v199_v3 = vld [vmem:[%s192_s22] sm:$0xff]  ;;  %v200_v4 = vld [vmem:[%s192_s22 + $0x8] sm:$0xff]  ;;  %v201_v5 = vld [vmem:[%s192_s22 + $0x10] sm:$0xff] }
  0x12   : > { %v204_v6 = vpack.c.bf16 %v200_v4, %v199_v3  ;;  %v202_v7 = vld [vmem:[%s192_s22 + $0x18] sm:$0xff]  ;;  %v203_v9 = vld [vmem:[%s192_s22 + $0x20] sm:$0x3] }
  0x13   : > { %v205_v8 = vpack.c.bf16 %v202_v7, %v201_v5  ;;  %v206_v10 = vpack.c.bf16 %v203_v9, %v203_v9  ;;  %v476_v3 = vld [vmem:[%s612_s2] ss:$0 sm:$0xff] }
  0x14   : > { %487 = vmatmul.mubr.msk.bf16.vlgmr.msra.gmra.mrb[0].mxu0 %vm214_vm2, %v204_v6  ;;  %v477_v9 = vld [vmem:[%s613_s3] ss:$0 sm:$0xff] }
  0x15   : > { %491 = vmatmul.mubr.msk.bf16.vlgmr.msra.gmra.mrb[0].mxu1 %vm214_vm2, %v205_v8 }
  0x16   : > { %494 = vmatprep.mubr.msk.bf16.mxu1 %vm533_vm1, %v532_v0 }
  0x1d   : > { %495 = vmatmul.mubr.msk.bf16.gmra.mrb[4].mxu1 %vm214_vm2, %v206_v10 }
  0xe7   : > { %v262_v11 = vpop.f32.mrb[0].mxu0 }
  0xe8   : > { %v270_v12 = vpop.f32.mrb[0].mxu1  ;;  %v488_v13 = vpop.f32.mrb[1].mxu0  ;;  %v285_v16 = vsel %vm284_vm3, %v262_v11, 0.0 }
  0xe9   : > { %v492_v14 = vpop.f32.mrb[1].mxu1  ;;  %v265_v15 = vpop.f32.mrb[2].mxu0  ;;  %v288_v22 = vsel %vm284_vm3, %v270_v12, 0.0 }
  0xea   : > { %v286_v17 = vsel %vm284_vm3, %v265_v15, 0.0  ;;  %v273_v18 = vpop.f32.mrb[2].mxu1  ;;  %v489_v19 = vpop.f32.mrb[3].mxu0 }
  0xeb   : > { %v287_v20 = vadd.f32 %v286_v17, %v285_v16  ;;  %v493_v21 = vpop.f32.mrb[3].mxu1  ;;  %v290_v24 = vsel %vm284_vm3, %v273_v18, 0.0 }
  0xed   : > { %v289_v23 = vadd.f32 %v288_v22, %v287_v20 }
  0xef   : > { %v291_v25 = vadd.f32 %v290_v24, %v289_v23 }
  0xf0   : > { %v278_v26 = vpop.f32.mrb[4].mxu1 }
  0xf1   : > { %v293_v27 = vsel %vm292_vm4, %v278_v26, 0.0  ;;  %v496_v28 = vpop.f32.mrb[5].mxu1 }
  0xf2   : > { %v294_v29 = vadd.f32 %v293_v27, %v291_v25  ;;  %v281_v30 = vpop.f32.mrb[6].mxu1 }
  0xf3   : > { %v497_v31 = vpop.f32.mrb[7].mxu1 }
  0xf4   : > { %v295_v32 = vrot.slane %v294_v29, 4 }
  0xf6   : > { %v296_v33 = vadd.f32 %v295_v32, %v294_v29 }
  0xf8   : > { %v297_v34 = vrot.slane %v296_v33, 2 }
  0xfa   : > { %v298_v35 = vadd.f32 %v297_v34, %v296_v33 }
  0xfc   : > { %v299_v36 = vrot.slane %v298_v35, 1 }
  0xfe   : > { %v300_v37 = vadd.f32 %v299_v36, %v298_v35 }
 0x100   : > { %v302_v38 = vmul.f32 0.029411765, %v300_v37 }
 0x102   : > { %v303_v39 = vsub.f32 %v262_v11, %v302_v38  ;;  %v304_v40 = vsub.f32 %v265_v15, %v302_v38  ;;  %v305_v41 = vsub.f32 %v270_v12, %v302_v38  ;;  %v306_v42 = vsub.f32 %v273_v18, %v302_v38 }
 0x103   : > { %v307_v43 = vsub.f32 %v278_v26, %v302_v38 }
 0x104   : > { %v308_v44 = vmul.f32 %v303_v39, %v303_v39  ;;  %v309_v45 = vmul.f32 %v304_v40, %v304_v40  ;;  %v310_v46 = vmul.f32 %v305_v41, %v305_v41  ;;  %v311_v47 = vmul.f32 %v306_v42, %v306_v42 }
 0x105   : > { %v312_v51 = vmul.f32 %v307_v43, %v307_v43 }
 0x106   : > { %v313_v48 = vsel %vm284_vm3, %v308_v44, 0.0  ;;  %v314_v49 = vsel %vm284_vm3, %v309_v45, 0.0  ;;  %v316_v52 = vsel %vm284_vm3, %v310_v46, 0.0  ;;  %v318_v54 = vsel %vm284_vm3, %v311_v47, 0.0 }
 0x107   : > { %v315_v50 = vadd.f32 %v314_v49, %v313_v48  ;;  %v320_v56 = vsel %vm292_vm4, %v312_v51, 0.0 }
 0x109   : > { %v317_v53 = vadd.f32 %v316_v52, %v315_v50 }
 0x10b   : > { %v319_v55 = vadd.f32 %v318_v54, %v317_v53 }
 0x10d   : > { %v321_v57 = vadd.f32 %v320_v56, %v319_v55 }
 0x10f   : > { %v322_v58 = vrot.slane %v321_v57, 4 }
 0x111   : > { %v323_v59 = vadd.f32 %v322_v58, %v321_v57 }
 0x113   : > { %v324_v60 = vrot.slane %v323_v59, 2 }
 0x115   : > { %v325_v61 = vadd.f32 %v324_v60, %v323_v59 }
 0x117   : > { %v326_v62 = vrot.slane %v325_v61, 1 }
 0x119   : > { %v327_v63 = vadd.f32 %v326_v62, %v325_v61 }
 0x11b   : > { %v328_v0 = vmul.f32 0.029411765, %v327_v63 }
 0x11d   : > { %v329_v1 = vadd.f32 1e-05, %v328_v0 }
 0x11f   : > { %512 = vrsqrt.f32 %v329_v1 }
 0x129   : > { %v513_v2 = vpop.eup %512 }
 0x12a   : > { %v331_v4 = vmul.f32 %v513_v2, %v303_v39  ;;  %v332_v5 = vmul.f32 %v513_v2, %v304_v40  ;;  %v333_v6 = vmul.f32 %v513_v2, %v305_v41  ;;  %v334_v7 = vmul.f32 %v513_v2, %v306_v42 }
 0x12b   : > { %v335_v8 = vmul.f32 %v513_v2, %v307_v43 }
 0x12c   : > { %v343_v10 = vmul.f32 %v476_v3, %v331_v4  ;;  %v344_v11 = vmul.f32 %v476_v3, %v332_v5  ;;  %v345_v12 = vmul.f32 %v476_v3, %v333_v6  ;;  %v346_v13 = vmul.f32 %v476_v3, %v334_v7 }
 0x12d   : > { %v347_v14 = vmul.f32 %v476_v3, %v335_v8 }
 0x12e   : > { %v355_v15 = vadd.f32 %v477_v9, %v343_v10  ;;  %v356_v16 = vadd.f32 %v477_v9, %v344_v11  ;;  %v357_v17 = vadd.f32 %v477_v9, %v345_v12  ;;  %v358_v18 = vadd.f32 %v477_v9, %v346_v13 }
 0x12f   : > { %v359_v19 = vadd.f32 %v477_v9, %v347_v14 }
 0x130   : > { %v360_v20 = vmul.f32 %v355_v15, %v355_v15  ;;  %v361_v21 = vmul.f32 %v356_v16, %v356_v16  ;;  %v362_v22 = vmul.f32 %v357_v17, %v357_v17  ;;  %v363_v23 = vmul.f32 %v358_v18, %v358_v18 }
 0x131   : > { %v364_v24 = vmul.f32 %v359_v19, %v359_v19 }
 0x132   : > { %v365_v25 = vmul.f32 %v360_v20, %v355_v15  ;;  %v366_v26 = vmul.f32 %v361_v21, %v356_v16  ;;  %v367_v27 = vmul.f32 %v362_v22, %v357_v17  ;;  %v368_v28 = vmul.f32 %v363_v23, %v358_v18 }
 0x133   : > { %v369_v29 = vmul.f32 %v364_v24, %v359_v19 }
 0x134   : > { %v370_v30 = vmul.f32 0.044715, %v365_v25  ;;  %v371_v31 = vmul.f32 0.044715, %v366_v26  ;;  %v372_v32 = vmul.f32 0.044715, %v367_v27 }
 0x135   : > { %v373_v33 = vmul.f32 0.044715, %v368_v28  ;;  %v374_v34 = vmul.f32 0.044715, %v369_v29 }
 0x136   : > { %v375_v35 = vadd.f32 %v370_v30, %v355_v15  ;;  %v376_v36 = vadd.f32 %v371_v31, %v356_v16  ;;  %v377_v37 = vadd.f32 %v372_v32, %v357_v17 }
 0x137   : > { %v378_v38 = vadd.f32 %v373_v33, %v358_v18  ;;  %v379_v39 = vadd.f32 %v374_v34, %v359_v19 }
 0x138   : > { %v380_v40 = vmul.f32 0.7978846, %v375_v35  ;;  %v381_v41 = vmul.f32 0.7978846, %v376_v36  ;;  %v382_v42 = vmul.f32 0.7978846, %v377_v37 }
 0x139   : > { %v383_v43 = vmul.f32 0.7978846, %v378_v38  ;;  %v384_v44 = vmul.f32 0.7978846, %v379_v39 }
 0x13a   : > { %514 = vtanh.f32 %v380_v40 }
 0x13b   : > { %516 = vtanh.f32 %v381_v41 }
 0x13c   : > { %518 = vtanh.f32 %v382_v42 }
 0x13d   : > { %520 = vtanh.f32 %v383_v43 }
 0x13e   : > { %522 = vtanh.f32 %v384_v44 }
 0x144   : > { %v515_v45 = vpop.eup %514 }
 0x145   : > { %v517_v46 = vpop.eup %516  ;;  %v390_v47 = vadd.f32 1.0, %v515_v45 }
 0x146   : > { %v519_v48 = vpop.eup %518  ;;  %v391_v49 = vadd.f32 1.0, %v517_v46 }
 0x147   : > { %v521_v50 = vpop.eup %520  ;;  %v392_v51 = vadd.f32 1.0, %v519_v48  ;;  %v395_v52 = vmul.f32 0.5, %v390_v47 }
 0x148   : > { %v523_v53 = vpop.eup %522  ;;  %v393_v54 = vadd.f32 1.0, %v521_v50  ;;  %v396_v55 = vmul.f32 0.5, %v391_v49 }
 0x149   : > { %v394_v56 = vadd.f32 1.0, %v523_v53  ;;  %v397_v57 = vmul.f32 0.5, %v392_v51  ;;  %v400_v58 = vmul.f32 %v395_v52, %v355_v15 }
 0x14a   : > { %v398_v59 = vmul.f32 0.5, %v393_v54  ;;  %v401_v60 = vmul.f32 %v396_v55, %v356_v16 }
 0x14b   : > { %v399_v61 = vmul.f32 0.5, %v394_v56  ;;  %v402_v62 = vmul.f32 %v397_v57, %v357_v17  ;;  %405 = vst.msk [vmem:[%s197_s29] sm:$0xff] %vm284_vm3, %v400_v58 }
 0x14c   : > { %v403_v63 = vmul.f32 %v398_v59, %v358_v18  ;;  %406 = vst.msk [vmem:[%s197_s29 + $0x8] sm:$0xff] %vm284_vm3, %v401_v60 }
 0x14d   : > { %v404_v0 = vmul.f32 %v399_v61, %v359_v19  ;;  %407 = vst.msk [vmem:[%s197_s29 + $0x10] sm:$0xff] %vm284_vm3, %v402_v62 }
 0x14e   : > { %408 = vst.msk [vmem:[%s197_s29 + $0x18] sm:$0xff] %vm284_vm3, %v403_v63 }
 0x14f   : > { %409 = vst.msk [vmem:[%s197_s29 + $0x20] sm:$0x3] %vm292_vm4, %v404_v0 }
 0x150 PF: > { %s14_s15 = sadd.s32 1, %s530_s15  }
 0x151   : > { %p11_p4 = scmp.ge.s32.totalorder %s14_s15, 4  }
 0x153   :  { %13 = sbr.rel (!%p11_p4) target bundleno = 1 (0x1), region = 66 }

// kernel: hubert_pretrain_forward.3
= control target key start
LH: loop header
LB: loop body
LE: loop exit
PB: predicated region body
PF: predicated region fallthrough
CT: control target
= control target key end

     0   :  { %s3421_s30 = smov 0   ;;  %s3819_s0 = inlined_call_operand.vmem [shape: f32[2,16,64], index: 0, kind: input, shape index: {}]   ;;  %s3820_s1 = inlined_call_operand.vmem [shape: bf16[64,32], index: 1, kind: input, shape index: {}]   ;;  %s3821_s2 = inlined_call_operand.vmem [shape: f32[1,32], index: 2, kind: input, shape index: {}]   ;;  %s3822_s3 = inlined_call_operand.vmem [shape: f32[1,32], index: 3, kind: input, shape index: {}]   ;;  %s3823_s4 = inlined_call_operand.vmem [shape: bf16[32,32], index: 4, kind: input, shape index: {}]   ;;  %s3824_s5 = inlined_call_operand.vmem [shape: f32[1,32], index: 5, kind: input, shape index: {}]   ;;  %s3825_s6 = inlined_call_operand.vmem [shape: f32[1,32], index: 6, kind: input, shape index: {}]   ;;  %s3826_s7 = inlined_call_operand.vmem [shape: f32[2,16,1], index: 7, kind: input, shape index: {}]   ;;  %s3827_s8 = inlined_call_operand.vmem [shape: f32[1,32], index: 8, kind: input, shape index: {}]   ;;  %s3828_s9 = inlined_call_operand.vmem [shape: f32[1,32], index: 9, kind: input, shape index: {}]   ;;  %s3829_s10 = inlined_call_operand.vmem [shape: bf16[2,32,96], index: 10, kind: input, shape index: {}]   ;;  %s3830_s11 = inlined_call_operand.vmem [shape: f32[2,1,96], index: 11, kind: input, shape index: {}]   ;;  %s3831_s12 = inlined_call_operand.vmem [shape: bf16[2,32,32], index: 12, kind: input, shape index: {}]   ;;  %s3832_s13 = inlined_call_operand.vmem [shape: f32[2,1,32], index: 13, kind: input, shape index: {}]   ;;  %s3833_s14 = inlined_call_operand.vmem [shape: f32[2,1,32], index: 14, kind: input, shape index: {}]   ;;  %s3834_s15 = inlined_call_operand.vmem [shape: f32[2,1,32], index: 15, kind: input, shape index: {}]   ;;  %s3835_s16 = inlined_call_operand.vmem [shape: bf16[2,32,64], index: 16, kind: input, shape index: {}]   ;;  %s3836_s17 = inlined_call_operand.vmem [shape: f32[2,1,64], index: 17, kind: input, shape index: {}]   ;;  %s3837_s18 = inlined_call_operand.vmem [shape: bf16[2,64,32], index: 18, kind: input, shape index: {}]   ;;  %s3838_s19 = inlined_call_operand.vmem [shape: f32[2,1,32], index: 19, kind: input, shape index: {}]   ;;  %s3839_s20 = inlined_call_operand.vmem [shape: f32[2,1,32], index: 20, kind: input, shape index: {}]   ;;  %s3840_s21 = inlined_call_operand.vmem [shape: f32[2,1,32], index: 21, kind: input, shape index: {}]   ;;  %s3841_s22 = inlined_call_operand.vmem [shape: bf16[32,16], index: 22, kind: input, shape index: {}]   ;;  %s3842_s23 = inlined_call_operand.vmem [shape: f32[1,16], index: 23, kind: input, shape index: {}]   ;;  %s3843_s24 = inlined_call_operand.vmem [shape: f32[8,16], index: 24, kind: input, shape index: {}]   ;;  %s3844_s25 = inlined_call_operand.vmem [shape: s32[2,16,1], index: 25, kind: input, shape index: {}]   ;;  %s3845_s26 = inlined_call_operand.vmem [shape: f32[2,8,128], index: 26, kind: output, shape index: {0}]   ;;  %s3846_s27 = inlined_call_operand.vmem [shape: f32[2,8,128], index: 27, kind: output, shape index: {1}]  }
   0x1   :  { %3857 = sst [smem:[#allocation11_spill]] %s3819_s0 }
   0x2   :  { %3858 = sst [smem:[#allocation12_spill]] %s3820_s1 }
   0x3   :  { %3859 = sst [smem:[#allocation13_spill]] %s3821_s2 }
   0x4   :  { %3860 = sst [smem:[#allocation14_spill]] %s3822_s3 }
   0x5   :  { %3861 = sst [smem:[#allocation15_spill]] %s3823_s4  ;;  %s3417_s4 = smov 0  }
   0x6   :  { %3862 = sst [smem:[#allocation16_spill]] %s3824_s5 }
   0x7   :  { %3863 = sst [smem:[#allocation17_spill]] %s3825_s6 }
   0x8   :  { %3864 = sst [smem:[#allocation18_spill]] %s3826_s7  ;;  %s3415_s7 = smov 0  }
   0x9   :  { %3865 = sst [smem:[#allocation19_spill]] %s3827_s8  ;;  %s3419_s8 = smov 0  }
   0xa   :  { %3866 = sst [smem:[#allocation20_spill]] %s3828_s9  ;;  %s3423_s9 = smov 0  }
   0xb   :  { %3867 = sst [smem:[#allocation21_spill]] %s3829_s10 }
   0xc   :  { %3868 = sst [smem:[#allocation22_spill]] %s3830_s11 }
   0xd   :  { %3869 = sst [smem:[#allocation23_spill]] %s3831_s12 }
   0xe   :  { %3870 = sst [smem:[#allocation24_spill]] %s3835_s16 }
   0xf   :  { %3871 = sst [smem:[#allocation25_spill]] %s3837_s18 }
  0x10   :  { %3872 = sst [smem:[#allocation26_spill]] %s3838_s19 }
  0x11   :  { %3873 = sst [smem:[#allocation27_spill]] %s3841_s22 }
  0x12   :  { %3874 = sst [smem:[#allocation28_spill]] %s3842_s23 }
  0x13   :  { %3875 = sst [smem:[#allocation29_spill]] %s3843_s24 }
  0x14   :  { %3876 = sst [smem:[#allocation30_spill]] %s3844_s25 }
  0x15   :  { %3877 = sst [smem:[#allocation31_spill]] %s3845_s26 }
  0x16   :  { %3878 = sst [smem:[#allocation32_spill]] %s3846_s27 }
  0x17 LB: > { %3879 = sst [smem:[#allocation3_spill]] %s3235_s7  ;;  %s47_s5 = sadd.s32 1, %s3243_s8  ;;  %s3251_s9 = sphi %s3423_s9, %s38_s9   ;;  %s3247_s30 = sphi %s3421_s30, %s3927_s30   ;;  %s3243_s8 = sphi %s3419_s8, %s3926_s8   ;;  %s3239_s4 = sphi %s3417_s4, %s3925_s4   ;;  %s3235_s7 = sphi %s3415_s7, %s3924_s7  }
  0x18   : > { %3880 = sst [smem:[#allocation4_spill]] %s3243_s8  ;;  %s50_s28 = sadd.s32 1, %s3247_s30 }
  0x19   : > { %3881 = sst [smem:[#allocation5_spill]] %s3247_s30  ;;  %p48_p0 = scmp.ge.s32.totalorder %s47_s5, 2 }
  0x1a   : > { %3882 = sst [smem:[#allocation6_spill]] %s3251_s9  ;;  %p2800_p1 = scmp.ge.s32.totalorder %s3251_s9, 1 }
  0x1b   : > { %p876_p2 = scmp.lt.s32.totalorder %s3251_s9, 5  ;;  %s3929_s5 = smov (%p48_p0, %s47_s5), 0 }
  0x1c   : > { %3883 = sst [smem:[#allocation7_spill]] %s3929_s5  ;;  %s3931_s28 = smov (!%p48_p0, %s50_s28), %s3247_s30 }
  0x1d   : > { %p877_p3 = pnand %p2800_p1, %p876_p2  ;;  %p52_p4 = scmp.ge.s32.totalorder %s3931_s28, 2 }
  0x1f   : > { %s3933_s28 = smov (%p52_p4, %s3931_s28), 0  ;;  %880 = sbr.rel (%p877_p3) target bundleno = 4900 (0x1324), region = 124 }
  0x20   : > { %3884 = sst [smem:[#allocation8_spill]] %s3933_s28 }
  0x26   : > { %p1005_p5 = scmp.lt.s32.totalorder %s3239_s4, 1  ;;  %p1015_p6 = scmp.lt.s32.totalorder %s3235_s7, 1 }
  0x27   : > { %s3885_s11 = sld [smem:[#allocation11_spill]]  ;;  %s3887_s5 = sld [smem:[#allocation18_spill]] }
  0x28   : > { %s3935_s4 = smov (!%p1005_p5, %s3239_s4), 1  ;;  %s3890_s26 = sld [smem:[#allocation21_spill]] }
  0x29   : > { %s3449_s0 = scalar_select %p1015_p6, %s3235_s7, 1 }
  0x2a   : > { %s2872_s10 = sshll.u32 %s3935_s4, 4  ;;  %s2815_s29 = sshll.u32 %s3935_s4, 3 }
  0x2b   : > { %s2874_s8 = sshll.u32 %s3449_s0, 4  ;;  %s3891_s12 = sld [smem:[#allocation23_spill]] }
  0x2c   : > { %s3892_s16 = sld [smem:[#allocation24_spill]]  ;;  %s3893_s18 = sld [smem:[#allocation25_spill]] }
  0x2d   : > { %s3454_s2 = scalar_lea.vmem %s3885_s11, %s2872_s10  ;;  %s3459_s30 = scalar_lea.vmem %s3887_s5, %s2872_s10 }
  0x2e   : > { %3886 = sst [smem:[#allocation9_spill]] %s3454_s2  ;;  %s3469_s4 = scalar_lea.vmem %s3890_s26, %s2874_s8 }
  0x2f   : > { %3888 = sst [smem:[#allocation10_spill]] %s3459_s30  ;;  %s1055_s27 = scalar_lea.vmem %s3839_s20, %s3449_s0 }
  0x30   : > { %s3895_s22 = sld [smem:[#allocation30_spill]]  ;;  %s3896_s11 = sld [smem:[#allocation31_spill]] }
  0x31   : > { %s3474_s6 = scalar_lea.vmem %s3891_s12, %s2874_s8  ;;  %s2877_s12 = sshll.u32 %s3449_s0, 5 }
  0x32   : > { %s3491_s7 = scalar_lea.vmem %s3892_s16, %s2874_s8  ;;  %s3501_s5 = scalar_lea.vmem %s3893_s18, %s2877_s12 }
  0x33   : > { %s3897_s23 = sld [smem:[#allocation32_spill]]  ;;  %s3898_s9 = sld [smem:[#allocation3_spill]] }
  0x36   : > { %s3518_s16 = scalar_lea.vmem %s3895_s22, %s2872_s10  ;;  %s3523_s18 = scalar_lea.vmem %s3896_s11, %s2815_s29 }
  0x39   : > { %s3528_s19 = scalar_lea.vmem %s3897_s23, %s2815_s29  ;;  %p2817_p7 = scmp.ne.s32.totalorder %s3898_s9, 0 }
  0x3a   : > { %s3899_s26 = sld [smem:[#allocation12_spill]] (!%p2817_p7)  ;;  %s3900_s30 = sld [smem:[#allocation9_spill]] (!%p2817_p7)  ;;  %v3253_v1 = vmov (!%p2817_p7), 0.0   ;;  %vm3254_vm0 = vmmov (!%p2817_p7), 0   ;;  %vm1112_vm1 = vcmask (!%p2817_p7), 523264   ;;  %vm1177_vm2 = vcmask (!%p2817_p7), 261120  }
  0x3b   : > { %1076 = sbr.rel (%p2817_p7) target bundleno = 1174 (0x496), region = 128  ;;  %2923 = vmatprep.subr.bf16.mxu0 (!%p2817_p7), %v3253_v1  ;;  %2935 = vmatprep.subr.bf16.mxu1 (!%p2817_p7), %v3253_v1  ;;  %s3902_s11 = sld [smem:[#allocation15_spill]] (!%p2817_p7)  ;;  %v3255_v46 = vmov (!%p2817_p7), 0  }
  0x3c   : > { %2931 = vmatprep.mubr.msk.bf16.mxu0 (!%p2817_p7), %vm3254_vm0, %v3253_v1  ;;  %2939 = vmatprep.mubr.msk.bf16.mxu1 (!%p2817_p7), %vm3254_vm0, %v3253_v1  ;;  %s3903_s8 = sld [smem:[#allocation13_spill]] (!%p2817_p7)  ;;  %s3904_s29 = sld [smem:[#allocation14_spill]] (!%p2817_p7) }
  0x3d   : > { %3107 = vset.pattern.permute.xlu1 (!%p2817_p7), %v3255_v46  ;;  %3106 = vset.pattern.permute.xlu0 (!%p2817_p7), %v3255_v46  ;;  %s3905_s1 = sld [smem:[#allocation16_spill]] (!%p2817_p7)  ;;  %s3906_s12 = sld [smem:[#allocation17_spill]] (!%p2817_p7) }
  0x3e   : > { %s3907_s24 = sld [smem:[#allocation19_spill]] (!%p2817_p7)  ;;  %s3908_s10 = sld [smem:[#allocation20_spill]] (!%p2817_p7) }
  0x40   : > { %v3108_v0 = vld [vmem:[%s3899_s26] sm:$0xff] (!%p2817_p7)   ;;  %v3109_v2 = vld [vmem:[%s3899_s26 + $0x8] sm:$0xff] (!%p2817_p7)   ;;  %v3110_v3 = vld [vmem:[%s3899_s26 + $0x10] sm:$0xff] (!%p2817_p7)  }
  0x41   : > { %2924 = vmatpush3.bf16.msra.mxu0 (!%p2817_p7), %v3108_v0  ;;  %v3111_v4 = vld [vmem:[%s3899_s26 + $0x18] sm:$0xff] (!%p2817_p7)   ;;  %v1077_v5 = vld [vmem:[%s3900_s30] sm:$0xff] (!%p2817_p7)  ;;  %v1078_v6 = vld [vmem:[%s3900_s30 + $0x8] sm:$0xff] (!%p2817_p7)  ;;  %s3901_s30 = sld [smem:[#allocation10_spill]] (!%p2817_p7) }
  0x42   : > { %2925 = vmatprep.subr.bf16.mxu0 %v3253_v1  ;;  %v1079_v7 = vpack.c.bf16 %v1078_v6, %v1077_v5  ;;  %v3112_v42 = vld [vmem:[%s3902_s11] sm:$0xff]   ;;  %v3113_v43 = vld [vmem:[%s3902_s11 + $0x8] sm:$0xff]  }
  0x43   : > { %2936 = vmatpush3.bf16.msra.mxu1 %v3112_v42  ;;  %v2823_v57 = vld [vmem:[%s3903_s8] ss:$0 sm:$0xff] }
  0x44   : > { %2937 = vmatprep.subr.bf16.mxu1 %v3253_v1  ;;  %v2824_v61 = vld [vmem:[%s3904_s29] ss:$0 sm:$0xff] }
  0x45   : > { %2926 = vmatpush3.bf16.msra.mxu0 %v3109_v2  ;;  %v2829_v5 = vld [vmem:[%s3906_s12] ss:$0 sm:$0xff] }
  0x46   : > { %2927 = vmatprep.subr.bf16.mxu0 %v3253_v1 }
  0x47   : > { %2938 = vmatpush3.bf16.msra.mxu1 %v3113_v43  ;;  %v1306_v44 = vld [vmem:[%s3901_s30 + $0x8] sm:$0xff]  ;;  %v1305_v45 = vld [vmem:[%s3901_s30] sm:$0xff] }
  0x48   : > { %v1308_v47 = vsub.f32 1.0, %v1306_v44  ;;  %v1307_v48 = vsub.f32 1.0, %v1305_v45 }
  0x49   : > { %2928 = vmatpush3.bf16.msra.mxu0 %v3110_v3 }
  0x4a   : > { %2929 = vmatprep.subr.bf16.mxu0 %v3253_v1 }
  0x4d   : > { %2930 = vmatpush3.bf16.msra.mxu0 %v3111_v4  ;;  %v2825_v4 = vld [vmem:[%s3905_s1] ss:$0 sm:$0xff] }
  0x50   : > { %2932 = vmatmul.mubr.msk.bf16.vlgmr.msra.gmra.mrb[0].mxu0 %vm1112_vm1, %v1079_v7 }
 0x123   : > { %v1150_v8 = vpop.f32.mrb[0].mxu0 }
 0x124   : > { %v1157_v9 = vmul.f32 %v1150_v8, %v1150_v8  ;;  %v2933_v10 = vpop.f32.mrb[1].mxu0 }
 0x125   : > { %v1153_v11 = vpop.f32.mrb[2].mxu0 }
 0x126   : > { %v1159_v12 = vmul.f32 %v1157_v9, %v1150_v8  ;;  %v1158_v13 = vmul.f32 %v1153_v11, %v1153_v11  ;;  %v2934_v14 = vpop.f32.mrb[3].mxu0 }
 0x128   : > { %v1161_v15 = vmul.f32 0.044715, %v1159_v12  ;;  %v1160_v16 = vmul.f32 %v1158_v13, %v1153_v11 }
 0x12a   : > { %v1163_v17 = vadd.f32 %v1161_v15, %v1150_v8  ;;  %v1162_v18 = vmul.f32 0.044715, %v1160_v16 }
 0x12c   : > { %v1165_v19 = vmul.f32 0.7978846, %v1163_v17  ;;  %v1164_v20 = vadd.f32 %v1162_v18, %v1153_v11 }
 0x12e   : > { %3114 = vtanh.f32 %v1165_v19  ;;  %v1166_v21 = vmul.f32 0.7978846, %v1164_v20 }
 0x130   : > { %3116 = vtanh.f32 %v1166_v21 }
 0x138   : > { %v3115_v22 = vpop.eup %3114 }
 0x139   : > { %v1169_v23 = vadd.f32 1.0, %v3115_v22 }
 0x13a   : > { %v3117_v24 = vpop.eup %3116 }
 0x13b   : > { %v1171_v25 = vmul.f32 0.5, %v1169_v23  ;;  %v1170_v26 = vadd.f32 1.0, %v3117_v24 }
 0x13d   : > { %v3552_v27 = vmul.f32 %v1171_v25, %v1150_v8  ;;  %v1172_v28 = vmul.f32 0.5, %v1170_v26 }
 0x13f   : > { %v1194_v29 = vsel %vm1177_vm2, %v3552_v27, 0.0  ;;  %v3556_v30 = vmul.f32 %v1172_v28, %v1153_v11  ;;  %v1175_v20 = vmul.f32 %v3552_v27, %v3552_v27 }
 0x140   : > { %1195 = vadd.xlane.f32.xlu0 %v1194_v29 }
 0x141   : > { %v1197_v31 = vsel %vm1177_vm2, %v3556_v30, 0.0  ;;  %v1176_v16 = vmul.f32 %v3556_v30, %v3556_v30  ;;  %v1178_v25 = vsel %vm1177_vm2, %v1175_v20, 0.0 }
 0x143   : > { %v1179_v23 = vsel %vm1177_vm2, %v1176_v16, 0.0 }
 0x144   : > { %1198 = vadd.xlane.f32.xlu0 %v1197_v31  ;;  %v1180_v26 = vadd.f32 %v1179_v23, %v1178_v25 }
 0x15a   : > { %1311 = vperm.xlu0 %3106, %v1307_v48  }
 0x1cd   : > { %v1196_v32 = vpop.xlane.xlu0 %1195 }
 0x1ce   : > { %v1201_v33 = vmul.f32 0.03125, %v1196_v32 }
 0x1d0   : > { %v1203_v34 = vsub.f32 %v3552_v27, %v1201_v33 }
 0x1d1   : > { %v1199_v35 = vpop.xlane.xlu0 %1198 }
 0x1d2   : > { %v1202_v36 = vmul.f32 0.03125, %v1199_v35  ;;  %v1205_v37 = vmul.f32 %v1203_v34, %v1203_v34 }
 0x1d4   : > { %v1204_v38 = vsub.f32 %v3556_v30, %v1202_v36  ;;  %v1207_v39 = vsel %vm1177_vm2, %v1205_v37, 0.0 }
 0x1d5   : > { %1208 = vadd.xlane.f32.xlu1 %v1207_v39 }
 0x1d6   : > { %v1206_v40 = vmul.f32 %v1204_v38, %v1204_v38 }
 0x1d8   : > { %v1210_v41 = vsel %vm1177_vm2, %v1206_v40, 0.0 }
 0x1d9   : > { %1211 = vadd.xlane.f32.xlu1 %v1210_v41  ;;  %v1312_v7 = vpop.permute.xlu0 %1311 }
 0x1ea   : > { %1316 = vperm.xlu1 %3107, %v1308_v47  }
 0x1ee   : > { %1324 = vperm.xlu1 %3107, %v1305_v45  }
 0x1f2   : > { %1329 = vperm.xlu1 %3107, %v1306_v44  }
 0x262   : > { %v1209_v49 = vpop.xlane.xlu1 %1208 }
 0x263   : > { %v1213_v50 = vmul.f32 0.03125, %v1209_v49 }
 0x265   : > { %v1215_v51 = vadd.f32 1e-05, %v1213_v50 }
 0x266   : > { %v1212_v52 = vpop.xlane.xlu1 %1211 }
 0x267   : > { %3118 = vrsqrt.f32 %v1215_v51  ;;  %v1214_v53 = vmul.f32 0.03125, %v1212_v52  ;;  %v2830_v52 = vld [vmem:[%s3907_s24] ss:$0 sm:$0xff] }
 0x269   : > { %v1216_v54 = vadd.f32 1e-05, %v1214_v53 }
 0x26a   : > { %v1317_v2 = vpop.permute.xlu1 %1316 }
 0x26b   : > { %3120 = vrsqrt.f32 %v1216_v54  ;;  %v2831_v54 = vld [vmem:[%s3908_s10] ss:$0 sm:$0xff] }
 0x26e   : > { %v1325_v3 = vpop.permute.xlu1 %1324 }
 0x26f   : > { %v1338_v12 = vmul.f32 %v2829_v5, %v1325_v3 }
 0x271   : > { %v3119_v55 = vpop.eup %3118 }
 0x272   : > { %v1219_v56 = vmul.f32 %v3119_v55, %v1203_v34  ;;  %v1330_v10 = vpop.permute.xlu1 %1329 }
 0x273   : > { %v1339_v17 = vmul.f32 %v2829_v5, %v1330_v10 }
 0x274   : > { %v1227_v60 = vmul.f32 %v2823_v57, %v1219_v56 }
 0x275   : > { %v3121_v58 = vpop.eup %3120 }
 0x276   : > { %v1220_v59 = vmul.f32 %v3121_v58, %v1204_v38  ;;  %v1235_v63 = vadd.f32 %v2824_v61, %v1227_v60 }
 0x278   : > { %v1228_v62 = vmul.f32 %v2823_v57, %v1220_v59 }
 0x27a   : > { %v1236_v0 = vadd.f32 %v2824_v61, %v1228_v62 }
 0x27c   : > { %v1237_v1 = vpack.c.bf16 %v1236_v0, %v1235_v63 }
 0x27e   : > { %2940 = vmatmul.mubr.msk.bf16.vlgmr.msra.gmra.mrb[0].mxu1 %vm1177_vm2, %v1237_v1 }
 0x351   : > { %v1298_v6 = vpop.f32.mrb[0].mxu1 }
 0x352   : > { %v1299_v8 = vadd.f32 %v2825_v4, %v1298_v6  ;;  %v2941_v9 = vpop.f32.mrb[1].mxu1 }
 0x353   : > { %v1301_v11 = vpop.f32.mrb[2].mxu1 }
 0x354   : > { %v1302_v13 = vadd.f32 %v2825_v4, %v1301_v11  ;;  %v1319_v14 = vmul.f32 %v1312_v7, %v1299_v8  ;;  %v2942_v15 = vpop.f32.mrb[3].mxu1 }
 0x356   : > { %v1320_v18 = vmul.f32 %v1317_v2, %v1302_v13  ;;  %v1340_v19 = vadd.f32 %v1338_v12, %v1319_v14 }
 0x358   : > { %v1344_v21 = vsel %vm1177_vm2, %v1340_v19, 0.0  ;;  %v1341_v22 = vadd.f32 %v1339_v17, %v1320_v18 }
 0x359   : > { %1345 = vadd.xlane.f32.xlu1 %v1344_v21 }
 0x35a   : > { %v1347_v24 = vsel %vm1177_vm2, %v1341_v22, 0.0 }
 0x35b   : > { %1348 = vadd.xlane.f32.xlu0 %v1347_v24 }
 0x35d   : > { %1181 = vadd.xlane.f32.xlu1 %v1180_v26 }
 0x3e6   : > { %v1346_v28 = vpop.xlane.xlu1 %1345 }
 0x3e7   : > { %v1350_v29 = vmul.f32 0.03125, %v1346_v28 }
 0x3e8   : > { %v1349_v30 = vpop.xlane.xlu0 %1348 }
 0x3e9   : > { %v1352_v31 = vsub.f32 %v1340_v19, %v1350_v29  ;;  %v1351_v32 = vmul.f32 0.03125, %v1349_v30 }
 0x3ea   : > { %v1182_v33 = vpop.xlane.xlu1 %1181 }
 0x3eb   : > { %v1353_v27 = vsub.f32 %v1341_v22, %v1351_v32  ;;  %v1183_v34 = vrot.slane %v1182_v33, 4  ;;  %v1354_v35 = vmul.f32 %v1352_v31, %v1352_v31 }
 0x3ed   : > { %v1184_v36 = vadd.f32 %v1183_v34, %v1182_v33  ;;  %v1356_v37 = vsel %vm1177_vm2, %v1354_v35, 0.0  ;;  %v1355_v38 = vmul.f32 %v1353_v27, %v1353_v27 }
 0x3ee   : > { %1357 = vadd.xlane.f32.xlu1 %v1356_v37 }
 0x3ef   : > { %v1185_v39 = vrot.slane %v1184_v36, 2  ;;  %v1359_v40 = vsel %vm1177_vm2, %v1355_v38, 0.0 }
 0x3f1   : > { %v1186_v41 = vadd.f32 %v1185_v39, %v1184_v36 }
 0x3f2   : > { %1360 = vadd.xlane.f32.xlu1 %v1359_v40 }
 0x3f3   : > { %v1187_v42 = vrot.slane %v1186_v41, 1 }
 0x3f5   : > { %v1188_v43 = vadd.f32 %v1187_v42, %v1186_v41 }
 0x3f7   : > { %3040 = vpush %v1188_v43 }
 0x428   : > { %s3041_s28 = spop %3040 }
 0x429   : > { %v1190_v44 = vstv %s3041_s28 }
 0x42a   : > { %1191 = vst [vmem:[%s3523_s18] sm:$0xff] %v1190_v44 }
 0x47b   : > { %v1358_v45 = vpop.xlane.xlu1 %1357 }
 0x47c   : > { %v1362_v46 = vmul.f32 0.03125, %v1358_v45 }
 0x47e   : > { %v1364_v47 = vadd.f32 1e-05, %v1362_v46 }
 0x47f   : > { %v1361_v48 = vpop.xlane.xlu1 %1360 }
 0x480   : > { %3122 = vrsqrt.f32 %v1364_v47  ;;  %v1363_v49 = vmul.f32 0.03125, %v1361_v48 }
 0x482   : > { %v1365_v50 = vadd.f32 1e-05, %v1363_v49 }
 0x484   : > { %3124 = vrsqrt.f32 %v1365_v50 }
 0x48a   : > { %v3123_v51 = vpop.eup %3122 }
 0x48b   : > { %v1368_v53 = vmul.f32 %v3123_v51, %v1352_v31 }
 0x48d   : > { %v1376_v55 = vmul.f32 %v2830_v52, %v1368_v53 }
 0x48e   : > { %v3125_v56 = vpop.eup %3124 }
 0x48f   : > { %v1384_v57 = vadd.f32 %v2831_v54, %v1376_v55  ;;  %v1369_v58 = vmul.f32 %v3125_v56, %v1353_v27 }
 0x491   : > { %1386 = vst.msk [vmem:[#allocation2] sm:$0xff] %vm1177_vm2, %v1384_v57  ;;  %v1377_v59 = vmul.f32 %v2830_v52, %v1369_v58 }
 0x493   : > { %v1385_v60 = vadd.f32 %v2831_v54, %v1377_v59 }
 0x495   : > { %1387 = vst.msk [vmem:[#allocation2 + $0x8] sm:$0xff] %vm1177_vm2, %v1385_v60 }
 0x496 PF: > { %v3141_v61 = vld [vmem:[%s3469_s4] sm:$0xff]   ;;  %v3256_v62 = vmov 0.0   ;;  %v3142_v63 = vld [vmem:[%s3469_s4 + $0x8] sm:$0xff]   ;;  %vm3257_vm3 = vmmov 0   ;;  %vm1414_vm4 = vcmask 261120   ;;  %s3909_s29 = sld [smem:[#allocation22_spill]] }
 0x497   : > { %2943 = vmatprep.subr.bf16.mxu0 %v3256_v62  ;;  %2951 = vmatprep.subr.bf16.mxu1 %v3256_v62  ;;  %s3258_s25 = smov 120   ;;  %s3259_s1 = smov 96   ;;  %vm1463_vm5 = vcmask 64512   ;;  %vm1511_vm6 = vcmask 130048   ;;  %vm1973_vm7 = vcmask 195584   ;;  %vm2217_vm8 = vcmask 523264  }
 0x498   : > { %2944 = vmatpush3.bf16.msra.mxu0 %v3141_v61  ;;  %2947 = vmatprep.mubr.msk.bf16.mxu0 %vm3257_vm3, %v3256_v62  ;;  %v3611_v0 = vld [vmem:[#allocation2] sm:$0xff]  ;;  %s3260_s30 = smov 80   ;;  %s3261_s2 = smov 88  }
 0x499   : > { %2945 = vmatprep.subr.bf16.mxu0 %v3256_v62  ;;  %2953 = vmatprep.mubr.msk.bf16.mxu1 %vm3257_vm3, %v3256_v62  ;;  %s3262_s12 = smov 72   ;;  %s3263_s28 = smov 112  }
 0x49a   : > { %s3264_s3 = smov 104   ;;  %s3265_s9 = smov 56  }
 0x49b   : > { %s3266_s24 = smov 64   ;;  %s3267_s8 = smov 48  }
 0x49c   : > { %v3613_v1 = vld [vmem:[#allocation2 + $0x8] sm:$0xff]  ;;  %2946 = vmatpush3.bf16.msra.mxu0 %v3142_v63  ;;  %s3910_s23 = scalar_lea.vmem %s3909_s29, %s3449_s0  ;;  %s3268_s22 = smov 40  }
 0x49d   : > { %v1390_v2 = vpack.c.bf16 %v3613_v1, %v3611_v0  ;;  %2957 = vmatprep.subr.bf16.mxu0 %v3256_v62  ;;  %v2832_v3 = vld [vmem:[%s3910_s23] ss:$0 sm:$0xff]  ;;  %s3269_s10 = smov 8   ;;  %s3270_s18 = smov 16  }
 0x49e   : > { %s3271_s4 = smov 24   ;;  %s3911_s23 = scalar_lea.vmem %s3832_s13, %s3449_s0 }
 0x49f   : > { %2948 = vmatmul.mubr.msk.bf16.vlgmr.msra.gmra.mrb[0].mxu0 %vm1414_vm4, %v1390_v2  ;;  %s3917_s29 = scalar_lea.vmem %s3840_s21, %s3449_s0 }
 0x4a0   : > { %2959 = vmatprep.mubr.msk.bf16.mxu0 %vm3257_vm3, %v3256_v62 }
 0x572   : > { %v1452_v4 = vpop.f32.mrb[0].mxu0 }
 0x573   : > { %v2949_v5 = vpop.f32.mrb[1].mxu0  ;;  %v1453_v7 = vadd.f32 %v2832_v3, %v1452_v4 }
 0x574   : > { %v1455_v6 = vpop.f32.mrb[2].mxu0 }
 0x575   : > { %v1456_v8 = vadd.f32 %v2832_v3, %v1455_v6  ;;  %v2950_v9 = vpop.f32.mrb[3].mxu0 }
 0x577   : > { %v3629_v10 = vpack.c.bf16 %v1456_v8, %v1453_v7 }
 0x579   : > { %1582 = vrot.lane.b32.xlu1 %v3629_v10, %s3258_s25  ;;  %1461 = vrot.lane.b32.xlu0 %v3629_v10, %s3259_s1 }
 0x57d   : > { %1705 = vrot.lane.b32.xlu1 %v3629_v10, %s3260_s30  ;;  %1584 = vrot.lane.b32.xlu0 %v3629_v10, %s3261_s2 }
 0x581   : > { %1826 = vrot.lane.b32.xlu1 %v3629_v10, %s3262_s12  ;;  %1703 = vrot.lane.b32.xlu0 %v3629_v10, %s3263_s28  ;;  %s3913_s12 = scalar_lea.vmem %s3834_s15, %s3449_s0 }
 0x585   : > { %1824 = vrot.lane.b32.xlu0 %v3629_v10, %s3264_s3 }
 0x5eb   : > { %v1462_v11 = vpop.permute.xlu0 %1461  ;;  %v1583_v14 = vpop.permute.xlu1 %1582 }
 0x5ec   : > { %v1468_v12 = vsel %vm1463_vm5, %v1462_v11, 0 }
 0x5ed   : > { %2952 = vmatpush3.bf16.xpose.msra.mxu1 %v1468_v12 }
 0x5ee   : > { %2963 = vmatprep.subr.bf16.mxu1 %v3256_v62 }
 0x5ef   : > { %v1585_v13 = vpop.permute.xlu0 %1584  ;;  %v1706_v16 = vpop.permute.xlu1 %1705 }
 0x5f0   : > { %v1590_v15 = vsel %vm1463_vm5, %v1585_v13, 0  ;;  %v1711_v17 = vsel %vm1463_vm5, %v1706_v16, 0 }
 0x5f3   : > { %v1827_v18 = vpop.permute.xlu1 %1826  ;;  %v1704_v19 = vpop.permute.xlu0 %1703 }
 0x5f4   : > { %2954 = vmatmul.mubr.msk.bf16.vlgmr.msra.gmra.mrb[0].mxu1 %vm1463_vm5, %v3629_v10  ;;  %v1832_v20 = vsel %vm1463_vm5, %v1827_v18, 0 }
 0x5f5   : > { %2964 = vmatpush3.bf16.xpose.msra.mxu1 %v1590_v15  ;;  %2965 = vmatprep.mubr.msk.bf16.mxu1 %vm3257_vm3, %v3256_v62 }
 0x5f6   : > { %2975 = vmatprep.subr.bf16.mxu1 %v3256_v62 }
 0x5f7   : > { %v1825_v21 = vpop.permute.xlu0 %1824 }
 0x5fc   : > { %2966 = vmatmul.mubr.msk.bf16.vlgmr.msra.gmra.mrb[4].mxu1 %vm1463_vm5, %v1583_v14 }
 0x5fd   : > { %2976 = vmatpush3.bf16.xpose.msra.mxu1 %v1711_v17  ;;  %2977 = vmatprep.mubr.msk.bf16.mxu1 %vm3257_vm3, %v3256_v62 }
 0x5fe   : > { %2987 = vmatprep.subr.bf16.mxu1 %v3256_v62 }
 0x604   : > { %2978 = vmatmul.mubr.msk.bf16.vlgmr.msra.gmra.mrb[8].mxu1 %vm1463_vm5, %v1704_v19 }
 0x605   : > { %2988 = vmatpush3.bf16.xpose.msra.mxu1 %v1832_v20  ;;  %2989 = vmatprep.mubr.msk.bf16.mxu1 %vm3257_vm3, %v3256_v62 }
 0x606   : > { %2999 = vmatprep.subr.bf16.mxu1 %v3256_v62 }
 0x60c   : > { %2990 = vmatmul.mubr.msk.bf16.vlgmr.msra.gmra.mrb[12].mxu1 %vm1463_vm5, %v1825_v21 }
 0x60d   : > { %3003 = vmatprep.mubr.msk.bf16.mxu1 %vm3257_vm3, %v3256_v62 }
 0x6c7   : > { %v1504_v22 = vpop.f32.mrb[0].mxu1 }
 0x6c8   : > { %v2955_v23 = vpop.f32.mrb[1].mxu1  ;;  %v1512_v24 = vsel %vm1511_vm6, %v1504_v22, -inf }
 0x6c9   : > { %1513 = vmax.xlane.f32.xlu1 %v1512_v24  ;;  %v1507_v25 = vpop.f32.mrb[2].mxu1 }
 0x6ca   : > { %v2956_v26 = vpop.f32.mrb[3].mxu1  ;;  %v1515_v28 = vsel %vm1511_vm6, %v1507_v25, -inf }
 0x6cb   : > { %1516 = vmax.xlane.f32.xlu0 %v1515_v28 }
 0x6cf   : > { %v1626_v29 = vpop.f32.mrb[4].mxu1 }
 0x6d0   : > { %v2967_v30 = vpop.f32.mrb[5].mxu1  ;;  %v1633_v31 = vsel %vm1511_vm6, %v1626_v29, -inf }
 0x6d1   : > { %1634 = vmax.xlane.f32.xlu0 %v1633_v31  ;;  %v1629_v32 = vpop.f32.mrb[6].mxu1 }
 0x6d2   : > { %v2968_v33 = vpop.f32.mrb[7].mxu1  ;;  %v1636_v27 = vsel %vm1511_vm6, %v1629_v32, -inf }
 0x6d3   : > { %1637 = vmax.xlane.f32.xlu1 %v1636_v27 }
 0x6d7   : > { %v1747_v34 = vpop.f32.mrb[8].mxu1 }
 0x6d8   : > { %v2979_v35 = vpop.f32.mrb[9].mxu1  ;;  %v1754_v36 = vsel %vm1511_vm6, %v1747_v34, -inf }
 0x6d9   : > { %1755 = vmax.xlane.f32.xlu0 %v1754_v36  ;;  %v1750_v37 = vpop.f32.mrb[10].mxu1 }
 0x6da   : > { %v2980_v38 = vpop.f32.mrb[11].mxu1  ;;  %v1757_v39 = vsel %vm1511_vm6, %v1750_v37, -inf }
 0x6db   : > { %1758 = vmax.xlane.f32.xlu1 %v1757_v39 }
 0x6df   : > { %v1868_v40 = vpop.f32.mrb[12].mxu1 }
 0x6e0   : > { %v2991_v41 = vpop.f32.mrb[13].mxu1  ;;  %v1875_v42 = vsel %vm1511_vm6, %v1868_v40, -inf }
 0x6e1   : > { %1876 = vmax.xlane.f32.xlu0 %v1875_v42  ;;  %v1871_v43 = vpop.f32.mrb[14].mxu1 }
 0x6e2   : > { %v2992_v44 = vpop.f32.mrb[15].mxu1  ;;  %v1878_v45 = vsel %vm1511_vm6, %v1871_v43, -inf }
 0x6e3   : > { %1879 = vmax.xlane.f32.xlu1 %v1878_v45 }
 0x756   : > { %v1514_v46 = vpop.xlane.xlu1 %1513 }
 0x757   : > { %v1518_v47 = vsub.f32 %v1504_v22, %v1514_v46 }
 0x758   : > { %v1517_v48 = vpop.xlane.xlu0 %1516 }
 0x759   : > { %v1520_v49 = vmul.f32 1.442695, %v1518_v47  ;;  %v1519_v50 = vsub.f32 %v1507_v25, %v1517_v48 }
 0x75b   : > { %3151 = vpow2.f32 %v1520_v49  ;;  %v1522_v51 = vmul.f32 1.442695, %v1519_v50 }
 0x75d   : > { %3153 = vpow2.f32 %v1522_v51 }
 0x75e   : > { %v1635_v52 = vpop.xlane.xlu0 %1634 }
 0x75f   : > { %v1639_v53 = vsub.f32 %v1626_v29, %v1635_v52 }
 0x760   : > { %v1638_v61 = vpop.xlane.xlu1 %1637 }
 0x761   : > { %v1641_v54 = vmul.f32 1.442695, %v1639_v53  ;;  %v1640_v63 = vsub.f32 %v1629_v32, %v1638_v61 }
 0x763   : > { %3155 = vpow2.f32 %v1641_v54  ;;  %v1643_v4 = vmul.f32 1.442695, %v1640_v63 }
 0x765   : > { %v3152_v55 = vpop.eup %3151  ;;  %3157 = vpow2.f32 %v1643_v4 }
 0x766   : > { %v1524_v56 = vsel %vm1511_vm6, %v3152_v55, 0.0  ;;  %v1756_v3 = vpop.xlane.xlu0 %1755 }
 0x767   : > { %v3154_v57 = vpop.eup %3153  ;;  %1525 = vadd.xlane.f32.xlu0 %v1524_v56  ;;  %v1760_v7 = vsub.f32 %v1747_v34, %v1756_v3  ;;  %v3143_v3 = vld [vmem:[%s3474_s6] sm:$0xff]  }
 0x768   : > { %v1527_v58 = vsel %vm1511_vm6, %v3154_v57, 0.0  ;;  %v1759_v2 = vpop.xlane.xlu1 %1758  ;;  %3000 = vmatpush3.bf16.msra.mxu1 %v3143_v3 }
 0x769   : > { %1528 = vadd.xlane.f32.xlu1 %v1527_v58  ;;  %v1761_v5 = vsub.f32 %v1750_v37, %v1759_v2  ;;  %v1762_v12 = vmul.f32 1.442695, %v1760_v7  ;;  %3001 = vmatprep.subr.bf16.mxu1 %v3256_v62 }
 0x76b   : > { %v1764_v9 = vmul.f32 1.442695, %v1761_v5 }
 0x76d   : > { %v3669_v59 = vpop.eup %3155  ;;  %3159 = vpow2.f32 %v1764_v9 }
 0x76e   : > { %v1645_v60 = vsel %vm1511_vm6, %v3669_v59, 0.0  ;;  %v1877_v8 = vpop.xlane.xlu0 %1876  ;;  %3161 = vpow2.f32 %v1762_v12 }
 0x76f   : > { %1646 = vadd.xlane.f32.xlu0 %v1645_v60  ;;  %v1881_v13 = vsub.f32 %v1868_v40, %v1877_v8  ;;  %v3158_v16 = vpop.eup %3157  ;;  %v3144_v8 = vld [vmem:[%s3474_s6 + $0x8] sm:$0xff]  }
 0x770   : > { %v1880_v6 = vpop.xlane.xlu1 %1879  ;;  %v1648_v17 = vsel %vm1511_vm6, %v3158_v16, 0.0  ;;  %3002 = vmatpush3.bf16.msra.mxu1 %v3144_v8 }
 0x771   : > { %v1882_v11 = vsub.f32 %v1871_v43, %v1880_v6  ;;  %v1883_v15 = vmul.f32 1.442695, %v1881_v13  ;;  %3015 = vmatprep.subr.bf16.mxu1 %v3256_v62 }
 0x773   : > { %v1885_v14 = vmul.f32 1.442695, %v1882_v11 }
 0x775   : > { %3163 = vpow2.f32 %v1885_v14 }
 0x776   : > { %3165 = vpow2.f32 %v1883_v15 }
 0x777   : > { %v3160_v18 = vpop.eup %3159 }
 0x778   : > { %v3162_v19 = vpop.eup %3161  ;;  %v1769_v20 = vsel %vm1511_vm6, %v3160_v18, 0.0 }
 0x779   : > { %v1766_v22 = vsel %vm1511_vm6, %v3162_v19, 0.0 }
 0x77a   : > { %1656 = vrot.lane.b32.xlu1 %v3629_v10, %s3265_s9  ;;  %s3914_s9 = scalar_lea.vmem %s3836_s17, %s3449_s0 }
 0x77f   : > { %v3677_v21 = vpop.eup %3163 }
 0x780   : > { %v3166_v23 = vpop.eup %3165  ;;  %v1890_v24 = vsel %vm1511_vm6, %v3677_v21, 0.0 }
 0x781   : > { %v1887_v25 = vsel %vm1511_vm6, %v3166_v23, 0.0 }
 0x785   : > { %1535 = vrot.lane.b32.xlu0 %v3629_v10, %s3266_s24 }
 0x79e   : > { %1649 = vadd.xlane.f32.xlu1 %v1648_v17 }
 0x7a2   : > { %1770 = vadd.xlane.f32.xlu1 %v1769_v20 }
 0x7a4   : > { %1767 = vadd.xlane.f32.xlu0 %v1766_v22 }
 0x7a6   : > { %1891 = vadd.xlane.f32.xlu1 %v1890_v24 }
 0x7a8   : > { %1888 = vadd.xlane.f32.xlu0 %v1887_v25 }
 0x7b7   : > { %1777 = vrot.lane.b32.xlu1 %v3629_v10, %s3267_s8  ;;  %s3915_s8 = sld [smem:[#allocation26_spill]] }
 0x7be   : > { %1898 = vrot.lane.b32.xlu0 %v3629_v10, %s3268_s22  ;;  %s3916_s22 = scalar_lea.vmem %s3915_s8, %s3449_s0 }
 0x7f4   : > { %v1526_v26 = vpop.xlane.xlu0 %1525 }
 0x7f5   : > { %3167 = vrcp.f32 %v1526_v26 }
 0x7f6   : > { %v1529_v28 = vpop.xlane.xlu1 %1528 }
 0x7f7   : > { %3169 = vrcp.f32 %v1529_v28 }
 0x7fa   : > { %v1657_v35 = vpop.permute.xlu1 %1656 }
 0x7fc   : > { %v1647_v29 = vpop.xlane.xlu0 %1646 }
 0x7fd   : > { %3171 = vrcp.f32 %v1647_v29 }
 0x7ff   : > { %v3168_v30 = vpop.eup %3167 }
 0x800   : > { %v1536_v31 = vpop.permute.xlu0 %1535  ;;  %v1532_v33 = vmul.f32 %v3168_v30, %v3152_v55 }
 0x801   : > { %v3170_v32 = vpop.eup %3169  ;;  %2958 = vmatpush3.bf16.msra.mxu0 %v1536_v31 }
 0x802   : > { %v1533_v27 = vmul.f32 %v3170_v32, %v3154_v57  ;;  %2969 = vmatprep.subr.bf16.mxu0 %v3256_v62 }
 0x804   : > { %v1534_v34 = vpack.c.bf16 %v1533_v27, %v1532_v33 }
 0x806   : > { %2960 = vmatmul.mubr.msk.bf16.vlgmr.msra.gmra.mrb[4].mxu0 %vm1511_vm6, %v1534_v34  ;;  %v2844_v34 = vld [vmem:[%s3911_s23] ss:$0 sm:$0xff]  ;;  %s3918_s23 = sld [smem:[#allocation3_spill]] }
 0x807   : > { %2970 = vmatpush3.bf16.msra.mxu0 %v1657_v35  ;;  %2971 = vmatprep.mubr.msk.bf16.mxu0 %vm3257_vm3, %v3256_v62  ;;  %v3172_v38 = vpop.eup %3171 }
 0x808   : > { %2981 = vmatprep.subr.bf16.mxu0 %v3256_v62  ;;  %v1653_v42 = vmul.f32 %v3172_v38, %v3669_v59 }
 0x80c   : > { %p2862_p8 = scmp.ne.s32.totalorder %s3918_s23, 1 }
 0x80d   : > { %s3919_s1 = sld [smem:[#allocation27_spill]] (!%p2862_p8)  ;;  %vm3273_vm9 = vmmov (!%p2862_p8), 0   ;;  %vm2542_vm12 = vcmask (!%p2862_p8), 7168  }
 0x82b   : > { %v1650_v10 = vpop.xlane.xlu1 %1649 }
 0x82c   : > { %3173 = vrcp.f32 %v1650_v10 }
 0x82f   : > { %v1771_v36 = vpop.xlane.xlu1 %1770 }
 0x830   : > { %3175 = vrcp.f32 %v1771_v36 }
 0x831   : > { %v1768_v37 = vpop.xlane.xlu0 %1767 }
 0x832   : > { %3177 = vrcp.f32 %v1768_v37 }
 0x833   : > { %v1892_v39 = vpop.xlane.xlu1 %1891 }
 0x835   : > { %v1889_v40 = vpop.xlane.xlu0 %1888 }
 0x836   : > { %v3174_v41 = vpop.eup %3173  ;;  %3179 = vrcp.f32 %v1889_v40 }
 0x837   : > { %v1654_v43 = vmul.f32 %v3174_v41, %v3158_v16  ;;  %3181 = vrcp.f32 %v1892_v39  ;;  %v1778_v46 = vpop.permute.xlu1 %1777 }
 0x839   : > { %v1655_v44 = vpack.c.bf16 %v1654_v43, %v1653_v42  ;;  %v1899_v52 = vpop.permute.xlu0 %1898 }
 0x83a   : > { %v3176_v45 = vpop.eup %3175 }
 0x83b   : > { %2972 = vmatmul.mubr.msk.bf16.vlgmr.msra.gmra.mrb[8].mxu0 %vm1511_vm6, %v1655_v44  ;;  %v1775_v49 = vmul.f32 %v3176_v45, %v3160_v18 }
 0x83c   : > { %v3178_v47 = vpop.eup %3177  ;;  %2982 = vmatpush3.bf16.msra.mxu0 %v1778_v46  ;;  %2983 = vmatprep.mubr.msk.bf16.mxu0 %vm3257_vm3, %v3256_v62 }
 0x83d   : > { %v1774_v48 = vmul.f32 %v3178_v47, %v3162_v19  ;;  %2993 = vmatprep.subr.bf16.mxu0 %v3256_v62 }
 0x83f   : > { %v1776_v50 = vpack.c.bf16 %v1775_v49, %v1774_v48 }
 0x840   : > { %v3180_v51 = vpop.eup %3179 }
 0x841   : > { %v3182_v53 = vpop.eup %3181  ;;  %v1895_v54 = vmul.f32 %v3180_v51, %v3166_v23 }
 0x842   : > { %v1896_v55 = vmul.f32 %v3182_v53, %v3677_v21  ;;  %v3146_v53 = vld [vmem:[%s3491_s7 + $0x8] sm:$0xff]  }
 0x843   : > { %2984 = vmatmul.mubr.msk.bf16.vlgmr.msra.gmra.mrb[12].mxu0 %vm1511_vm6, %v1776_v50 }
 0x844   : > { %2994 = vmatpush3.bf16.msra.mxu0 %v1899_v52  ;;  %2995 = vmatprep.mubr.msk.bf16.mxu0 %vm3257_vm3, %v3256_v62  ;;  %v1897_v56 = vpack.c.bf16 %v1896_v55, %v1895_v54 }
 0x845   : > { %3007 = vmatprep.subr.bf16.mxu0 %v3256_v62 }
 0x84b   : > { %2996 = vmatmul.mubr.msk.bf16.vlgmr.msra.gmra.mrb[16].mxu0 %vm1511_vm6, %v1897_v56 }
 0x84c   : > { %3011 = vmatprep.mubr.msk.bf16.mxu0 %vm3257_vm3, %v3256_v62 }
 0x8d9   : > { %v1575_v57 = vpop.f32.mrb[4].mxu0 }
 0x8da   : > { %v2961_v58 = vpop.f32.mrb[5].mxu0 }
 0x8db   : > { %v1578_v59 = vpop.f32.mrb[6].mxu0 }
 0x8dc   : > { %v2962_v60 = vpop.f32.mrb[7].mxu0 }
 0x90e   : > { %v1696_v61 = vpop.f32.mrb[8].mxu0 }
 0x90f   : > { %v2973_v63 = vpop.f32.mrb[9].mxu0 }
 0x910   : > { %v1699_v2 = vpop.f32.mrb[10].mxu0 }
 0x911   : > { %v3126_v4 = vpack.i.bf16 %v1699_v2, %v1696_v61  ;;  %v2974_v5 = vpop.f32.mrb[11].mxu0 }
 0x912   : > { %v2849_v5 = vld [vmem:[%s3913_s12] ss:$0 sm:$0xff]  ;;  %s3920_s12 = sld [smem:[#allocation29_spill]] (!%p2862_p8) }
 0x913   : > { %3127 = vrot.lane.b32.xlu1 %v3126_v4, %s3269_s10 }
 0x916   : > { %v1817_v6 = vpop.f32.mrb[12].mxu0 }
 0x917   : > { %v2985_v7 = vpop.f32.mrb[13].mxu0 }
 0x918   : > { %v1820_v9 = vpop.f32.mrb[14].mxu0 }
 0x919   : > { %v3131_v11 = vpack.i.bf16 %v1820_v9, %v1817_v6  ;;  %v2986_v12 = vpop.f32.mrb[15].mxu0 }
 0x91a   : > { %v3148_v12 = vld [vmem:[%s3501_s5 + $0x8] sm:$0xff]  }
 0x91b   : > { %3132 = vrot.lane.b32.xlu0 %v3131_v11, %s3270_s18  ;;  %v3147_v11 = vld [vmem:[%s3501_s5] sm:$0xff]  }
 0x91e   : > { %v1938_v13 = vpop.f32.mrb[16].mxu0 }
 0x91f   : > { %v2997_v14 = vpop.f32.mrb[17].mxu0 }
 0x920   : > { %v1941_v15 = vpop.f32.mrb[18].mxu0  ;;  %v3150_v14 = vld [vmem:[%s3501_s5 + $0x18] sm:$0xff]  }
 0x921   : > { %v3136_v16 = vpack.i.bf16 %v1941_v15, %v1938_v13  ;;  %v2998_v17 = vpop.f32.mrb[19].mxu0  ;;  %v3149_v13 = vld [vmem:[%s3501_s5 + $0x10] sm:$0xff]   ;;  %v2850_v15 = vld [vmem:[%s3914_s9] ss:$0 sm:$0xff]  ;;  %s3921_s9 = sld [smem:[#allocation28_spill]] (!%p2862_p8) }
 0x923   : > { %3137 = vrot.lane.b32.xlu1 %v3136_v16, %s3271_s4 }
 0x985   : > { %v3128_v18 = vpop.permute.xlu1 %3127 }
 0x986   : > { %v3130_v20 = vunpack.i.h.bf16 %v3128_v18  ;;  %v3129_v21 = vunpack.i.l.bf16 %v3128_v18 }
 0x988   : > { %v1970_v25 = vsel %vm1463_vm5, %v1578_v59, %v3130_v20  ;;  %v1969_v26 = vsel %vm1463_vm5, %v1575_v57, %v3129_v21 }
 0x98d   : > { %v3133_v19 = vpop.permute.xlu0 %3132 }
 0x98e   : > { %v3135_v22 = vunpack.i.h.bf16 %v3133_v19  ;;  %v3134_v23 = vunpack.i.l.bf16 %v3133_v19 }
 0x990   : > { %v1972_v30 = vsel %vm1511_vm6, %v1970_v25, %v3135_v22  ;;  %v1971_v31 = vsel %vm1511_vm6, %v1969_v26, %v3134_v23 }
 0x995   : > { %v3138_v24 = vpop.permute.xlu1 %3137 }
 0x996   : > { %v3140_v28 = vunpack.i.h.bf16 %v3138_v24  ;;  %v3139_v29 = vunpack.i.l.bf16 %v3138_v24 }
 0x998   : > { %v1975_v32 = vsel %vm1973_vm7, %v1972_v30, %v3140_v28  ;;  %v1974_v33 = vsel %vm1973_vm7, %v1971_v31, %v3139_v29 }
 0x999   : > { %v1976_v27 = vpack.c.bf16 %v1975_v32, %v1974_v33 }
 0x99b   : > { %3004 = vmatmul.mubr.msk.bf16.vlgmr.msra.gmra.mrb[16].mxu1 %vm1414_vm4, %v1976_v27 }
 0x99c   : > { %3023 = vmatprep.mubr.msk.bf16.mxu1 %vm3257_vm3, %v3256_v62  ;;  %3016 = vmatpush3.bf16.msra.mxu1 %v3147_v11 }
 0x99d   : > { %3017 = vmatprep.subr.bf16.mxu1 %v3256_v62 }
 0x9a0   : > { %3018 = vmatpush3.bf16.msra.mxu1 %v3148_v12 }
 0x9a1   : > { %3019 = vmatprep.subr.bf16.mxu1 %v3256_v62 }
 0x9a4   : > { %3020 = vmatpush3.bf16.msra.mxu1 %v3149_v13 }
 0x9a5   : > { %3021 = vmatprep.subr.bf16.mxu1 %v3256_v62 }
 0x9a8   : > { %3022 = vmatpush3.bf16.msra.mxu1 %v3150_v14  ;;  %v3197_v14 = vld [vmem:[%s3919_s1] sm:$0xff] (!%p2862_p8)  }
 0xa6e   : > { %v2037_v35 = vpop.f32.mrb[16].mxu1 }
 0xa6f   : > { %v2038_v10 = vadd.f32 %v2844_v34, %v2037_v35  ;;  %v3005_v36 = vpop.f32.mrb[17].mxu1 }
 0xa70   : > { %v2040_v37 = vpop.f32.mrb[18].mxu1 }
 0xa71   : > { %v2041_v38 = vadd.f32 %v2844_v34, %v2040_v37  ;;  %v3006_v39 = vpop.f32.mrb[19].mxu1  ;;  %v2044_v40 = vadd.f32 %v2038_v10, %v3611_v0 }
 0xa72   : > { %v2854_v39 = vld [vmem:[%s3916_s22] ss:$0 sm:$0xff] }
 0xa73   : > { %v2048_v41 = vsel %vm1414_vm4, %v2044_v40, 0.0  ;;  %v2045_v42 = vadd.f32 %v2041_v38, %v3613_v1  ;;  %v3145_v1 = vld [vmem:[%s3491_s7] sm:$0xff]   ;;  %s3912_s7 = scalar_lea.vmem %s3833_s14, %s3449_s0 }
 0xa74   : > { %2049 = vadd.xlane.f32.xlu0 %v2048_v41  ;;  %3008 = vmatpush3.bf16.msra.mxu0 %v3145_v1  ;;  %v2848_v63 = vld [vmem:[%s3912_s7] ss:$0 sm:$0xff] }
 0xa75   : > { %v2051_v43 = vsel %vm1414_vm4, %v2045_v42, 0.0  ;;  %3009 = vmatprep.subr.bf16.mxu0 %v3256_v62 }
 0xa76   : > { %2052 = vadd.xlane.f32.xlu1 %v2051_v43 }
 0xa78   : > { %3010 = vmatpush3.bf16.msra.mxu0 %v3146_v53 }
 0xb01   : > { %v2050_v44 = vpop.xlane.xlu0 %2049 }
 0xb02   : > { %v2055_v45 = vmul.f32 0.03125, %v2050_v44 }
 0xb03   : > { %v2053_v46 = vpop.xlane.xlu1 %2052 }
 0xb04   : > { %v2057_v47 = vsub.f32 %v2044_v40, %v2055_v45  ;;  %v2056_v48 = vmul.f32 0.03125, %v2053_v46 }
 0xb06   : > { %v2058_v49 = vsub.f32 %v2045_v42, %v2056_v48  ;;  %v2059_v50 = vmul.f32 %v2057_v47, %v2057_v47 }
 0xb08   : > { %v2061_v51 = vsel %vm1414_vm4, %v2059_v50, 0.0  ;;  %v2060_v0 = vmul.f32 %v2058_v49, %v2058_v49 }
 0xb09   : > { %2062 = vadd.xlane.f32.xlu0 %v2061_v51 }
 0xb0a   : > { %v2064_v52 = vsel %vm1414_vm4, %v2060_v0, 0.0 }
 0xb0d   : > { %2065 = vadd.xlane.f32.xlu0 %v2064_v52 }
 0xb96   : > { %v2063_v54 = vpop.xlane.xlu0 %2062 }
 0xb97   : > { %v2067_v55 = vmul.f32 0.03125, %v2063_v54 }
 0xb99   : > { %v2069_v56 = vadd.f32 1e-05, %v2067_v55 }
 0xb9a   : > { %v2066_v57 = vpop.xlane.xlu0 %2065 }
 0xb9b   : > { %3183 = vrsqrt.f32 %v2069_v56  ;;  %v2068_v58 = vmul.f32 0.03125, %v2066_v57 }
 0xb9d   : > { %v2070_v59 = vadd.f32 1e-05, %v2068_v58 }
 0xb9f   : > { %3185 = vrsqrt.f32 %v2070_v59 }
 0xba5   : > { %v3184_v60 = vpop.eup %3183 }
 0xba6   : > { %v2073_v61 = vmul.f32 %v3184_v60, %v2057_v47 }
 0xba8   : > { %v2081_v3 = vmul.f32 %v2848_v63, %v2073_v61 }
 0xba9   : > { %v3186_v2 = vpop.eup %3185 }
 0xbaa   : > { %v2074_v4 = vmul.f32 %v3186_v2, %v2058_v49  ;;  %v2089_v7 = vadd.f32 %v2849_v5, %v2081_v3 }
 0xbac   : > { %v2082_v6 = vmul.f32 %v2848_v63, %v2074_v4  ;;  %v2860_v4 = vld [vmem:[%s1055_s27] ss:$0 sm:$0xff] }
 0xbae   : > { %v2090_v8 = vadd.f32 %v2849_v5, %v2082_v6 }
 0xbb0   : > { %v2091_v9 = vpack.c.bf16 %v2090_v8, %v2089_v7 }
 0xbb2   : > { %3012 = vmatmul.mubr.msk.bf16.vlgmr.msra.gmra.mrb[20].mxu0 %vm1414_vm4, %v2091_v9 }
 0xc85   : > { %v2152_v16 = vpop.f32.mrb[20].mxu0 }
 0xc86   : > { %v2153_v17 = vadd.f32 %v2850_v15, %v2152_v16  ;;  %v3013_v18 = vpop.f32.mrb[21].mxu0  ;;  %v3198_v16 = vld [vmem:[%s3919_s1 + $0x8] sm:$0xff] (!%p2862_p8)  }
 0xc87   : > { %v2155_v19 = vpop.f32.mrb[22].mxu0 }
 0xc88   : > { %v2159_v20 = vmul.f32 %v2153_v17, %v2153_v17  ;;  %v2156_v21 = vadd.f32 %v2850_v15, %v2155_v19  ;;  %v3014_v22 = vpop.f32.mrb[23].mxu0  ;;  %v3272_v15 = vmov (!%p2862_p8), 0.0  }
 0xc89   : > { %3027 = vmatprep.subr.bf16.mxu0 (!%p2862_p8), %v3272_v15  ;;  %3031 = vmatprep.mubr.msk.bf16.mxu0 (!%p2862_p8), %vm3273_vm9, %v3272_v15 }
 0xc8a   : > { %v2161_v23 = vmul.f32 %v2159_v20, %v2153_v17  ;;  %v2160_v24 = vmul.f32 %v2156_v21, %v2156_v21  ;;  %3028 = vmatpush3.bf16.msra.mxu0 (!%p2862_p8), %v3197_v14  ;;  %v2398_v20 = vld [vmem:[%s3920_s12] sm:$0xff] (!%p2862_p8) }
 0xc8b   : > { %3029 = vmatprep.subr.bf16.mxu0 (!%p2862_p8), %v3272_v15 }
 0xc8c   : > { %v2163_v25 = vmul.f32 0.044715, %v2161_v23  ;;  %v2162_v26 = vmul.f32 %v2160_v24, %v2156_v21  ;;  %v2863_v23 = vld [vmem:[%s3921_s9] ss:$0 sm:$0xff] (!%p2862_p8) }
 0xc8e   : > { %v2165_v28 = vadd.f32 %v2163_v25, %v2153_v17  ;;  %v2164_v62 = vmul.f32 0.044715, %v2162_v26  ;;  %3030 = vmatpush3.bf16.msra.mxu0 (!%p2862_p8), %v3198_v16 }
 0xc90   : > { %v2167_v29 = vmul.f32 0.7978846, %v2165_v28  ;;  %v2166_v30 = vadd.f32 %v2164_v62, %v2156_v21 }
 0xc92   : > { %3187 = vtanh.f32 %v2167_v29  ;;  %v2168_v31 = vmul.f32 0.7978846, %v2166_v30 }
 0xc94   : > { %3189 = vtanh.f32 %v2168_v31 }
 0xc9c   : > { %v3188_v32 = vpop.eup %3187 }
 0xc9d   : > { %v2171_v33 = vadd.f32 1.0, %v3188_v32 }
 0xc9e   : > { %v3190_v27 = vpop.eup %3189 }
 0xc9f   : > { %v2173_v34 = vmul.f32 0.5, %v2171_v33  ;;  %v2172_v35 = vadd.f32 1.0, %v3190_v27 }
 0xca1   : > { %v2174_v10 = vmul.f32 0.5, %v2172_v35  ;;  %v2175_v36 = vmul.f32 %v2173_v34, %v2153_v17 }
 0xca3   : > { %v2176_v37 = vmul.f32 %v2174_v10, %v2156_v21  ;;  %v2399_v21 = vmul.f32 (!%p2862_p8), %v2398_v20, %v2398_v20 }
 0xca5   : > { %v2177_v38 = vpack.c.bf16 %v2176_v37, %v2175_v36  ;;  %v2400_v22 = vsel (!%p2862_p8), %vm1511_vm6, %v2399_v21, 0.0 }
 0xca7   : > { %3024 = vmatmul.mubr.msk.bf16.vlgmr.msra.gmra.mrb[20].mxu1 %vm2217_vm8, %v2177_v38 }
 0xd7a   : > { %v2255_v40 = vpop.f32.mrb[20].mxu1 }
 0xd7b   : > { %v2256_v41 = vadd.f32 %v2854_v39, %v2255_v40  ;;  %v3025_v42 = vpop.f32.mrb[21].mxu1 }
 0xd7c   : > { %v2258_v43 = vpop.f32.mrb[22].mxu1 }
 0xd7d   : > { %v2259_v44 = vadd.f32 %v2854_v39, %v2258_v43  ;;  %v3026_v45 = vpop.f32.mrb[23].mxu1  ;;  %v2262_v46 = vadd.f32 %v2256_v41, %v2089_v7  ;;  %v2861_v7 = vld [vmem:[%s3917_s29] ss:$0 sm:$0xff] }
 0xd7f   : > { %v2266_v47 = vsel %vm1414_vm4, %v2262_v46, 0.0  ;;  %v2263_v48 = vadd.f32 %v2259_v44, %v2090_v8  ;;  %v3274_v44 = vmov (!%p2862_p8), 0  }
 0xd80   : > { %2267 = vadd.xlane.f32.xlu1 %v2266_v47  ;;  %3196 = vset.pattern.permute.xlu0 (!%p2862_p8), %v3274_v44 }
 0xd81   : > { %v2269_v49 = vsel %vm1414_vm4, %v2263_v48, 0.0  ;;  %3195 = vset.pattern.permute.xlu1 (!%p2862_p8), %v3274_v44 }
 0xd82   : > { %2270 = vadd.xlane.f32.xlu0 %v2269_v49 }
 0xe0d   : > { %v2268_v50 = vpop.xlane.xlu1 %2267 }
 0xe0e   : > { %v2272_v51 = vmul.f32 0.03125, %v2268_v50 }
 0xe0f   : > { %v2271_v0 = vpop.xlane.xlu0 %2270 }
 0xe10   : > { %v2274_v52 = vsub.f32 %v2262_v46, %v2272_v51  ;;  %v2273_v1 = vmul.f32 0.03125, %v2271_v0  ;;  %v2518_v51 = vld [vmem:[%s3518_s16] sm:$0xff] (!%p2862_p8)  ;;  %v2519_v0 = vld [vmem:[%s3518_s16 + $0x8] sm:$0xff] (!%p2862_p8)  ;;  %s3922_s16 = sld [smem:[#allocation10_spill]] (!%p2862_p8) }
 0xe12   : > { %v2275_v53 = vsub.f32 %v2263_v48, %v2273_v1  ;;  %v2276_v54 = vmul.f32 %v2274_v52, %v2274_v52 }
 0xe14   : > { %v2278_v55 = vsel %vm1414_vm4, %v2276_v54, 0.0  ;;  %v2277_v56 = vmul.f32 %v2275_v53, %v2275_v53 }
 0xe15   : > { %2279 = vadd.xlane.f32.xlu1 %v2278_v55 }
 0xe16   : > { %v2281_v57 = vsel %vm1414_vm4, %v2277_v56, 0.0 }
 0xe17   : > { %2282 = vadd.xlane.f32.xlu0 %v2281_v57  ;;  %v2516_v57 = vlaneseq (!%p2862_p8) }
 0xe1b   : > { %2401 = vadd.xlane.f32.xlu0 (!%p2862_p8), %v2400_v22 }
 0xea2   : > { %v2280_v58 = vpop.xlane.xlu1 %2279 }
 0xea3   : > { %v2284_v59 = vmul.f32 0.03125, %v2280_v58  ;;  %v2517_v58 = vand.u32 (!%p2862_p8), 127, %v2516_v57 }
 0xea4   : > { %v2283_v60 = vpop.xlane.xlu0 %2282 }
 0xea5   : > { %v2286_v61 = vadd.f32 1e-05, %v2284_v59  ;;  %v2285_v63 = vmul.f32 0.03125, %v2283_v60 }
 0xea7   : > { %3191 = vrsqrt.f32 %v2286_v61  ;;  %v2287_v2 = vadd.f32 1e-05, %v2285_v63 }
 0xea8   : > { %v2402_v27 = vpop.xlane.xlu0 (!%p2862_p8), %2401 }
 0xea9   : > { %3193 = vrsqrt.f32 %v2287_v2  ;;  %v2403_v34 = vadd.f32 (!%p2862_p8), 1e-12, %v2402_v27 }
 0xeab   : > { %3199 = vrsqrt.f32 (!%p2862_p8), %v2403_v34 }
 0xeb1   : > { %v3192_v3 = vpop.eup %3191 }
 0xeb2   : > { %v2290_v5 = vmul.f32 %v3192_v3, %v2274_v52 }
 0xeb3   : > { %v3194_v6 = vpop.eup %3193 }
 0xeb4   : > { %v2298_v8 = vmul.f32 %v2860_v4, %v2290_v5  ;;  %v2291_v9 = vmul.f32 %v3194_v6, %v2275_v53  ;;  %2313 = sbr.rel (%p2862_p8) target bundleno = 4900 (0x1324), region = 132 }
 0xeb5   : > { %v3200_v35 = vpop.eup (!%p2862_p8), %3199 }
 0xeb6   : > { %v2306_v11 = vadd.f32 %v2861_v7, %v2298_v8  ;;  %v2299_v12 = vmul.f32 %v2860_v4, %v2291_v9  ;;  %v2405_v10 = vmul.f32 (!%p2862_p8), %v3200_v35, %v2398_v20  ;;  %v2538_v20 = vld [vmem:[%s3922_s16] sm:$0xff] (!%p2862_p8) }
 0xeb8   : > { %2308 = vst.msk [vmem:[#allocation2] sm:$0xff] %vm1414_vm4, %v2306_v11  ;;  %v2307_v13 = vadd.f32 %v2861_v7, %v2299_v12  ;;  %3035 = vmatprep.subr.msk.mxu1 (!%p2862_p8), %vm1511_vm6, %v2405_v10 }
 0xeb9   : > { %3036 = vmatpush3.xpose.msk.msra.mxu1 (!%p2862_p8), %vm1511_vm6, %v2405_v10 }
 0xeba   : > { %2309 = vst.msk [vmem:[#allocation2 + $0x8] sm:$0xff] %vm1414_vm4, %v2307_v13 }
 0xebf   : > { %v2314_v17 = vld [vmem:[#allocation2] sm:$0xff] }
 0xec1   : > { %v2315_v18 = vld [vmem:[#allocation2 + $0x8] sm:$0xff] }
 0xec2   : > { %v2316_v19 = vpack.c.bf16 %v2315_v18, %v2314_v17  ;;  %v2539_v18 = vld [vmem:[%s3922_s16 + $0x8] sm:$0xff] }
 0xec4   : > { %3032 = vmatmul.mubr.msk.bf16.vlgmr.msra.gmra.mrb[0].mxu0 %vm1414_vm4, %v2316_v19 }
 0xf97   : > { %v2377_v24 = vpop.f32.mrb[0].mxu0 }
 0xf98   : > { %v2378_v25 = vadd.f32 %v2863_v23, %v2377_v24  ;;  %v3033_v26 = vpop.f32.mrb[1].mxu0 }
 0xf99   : > { %v2380_v28 = vpop.f32.mrb[2].mxu0 }
 0xf9a   : > { %v2381_v62 = vadd.f32 %v2863_v23, %v2380_v28  ;;  %v3034_v29 = vpop.f32.mrb[3].mxu0  ;;  %v2384_v30 = vmul.f32 %v2378_v25, %v2378_v25 }
 0xf9c   : > { %v2386_v31 = vsel %vm1511_vm6, %v2384_v30, 0.0  ;;  %v2385_v32 = vmul.f32 %v2381_v62, %v2381_v62 }
 0xf9d   : > { %2387 = vadd.xlane.f32.xlu0 %v2386_v31 }
 0xf9e   : > { %v2389_v33 = vsel %vm1511_vm6, %v2385_v32, 0.0 }
 0xf9f   : > { %2390 = vadd.xlane.f32.xlu1 %v2389_v33 }
0x102a   : > { %v2388_v36 = vpop.xlane.xlu0 %2387 }
0x102b   : > { %v2392_v37 = vadd.f32 1e-12, %v2388_v36 }
0x102c   : > { %v2391_v38 = vpop.xlane.xlu1 %2390 }
0x102d   : > { %3201 = vrsqrt.f32 %v2392_v37  ;;  %v2393_v39 = vadd.f32 1e-12, %v2391_v38 }
0x102f   : > { %3203 = vrsqrt.f32 %v2393_v39 }
0x1037   : > { %v3202_v40 = vpop.eup %3201 }
0x1038   : > { %v2396_v41 = vmul.f32 %v3202_v40, %v2378_v25 }
0x1039   : > { %v3204_v42 = vpop.eup %3203 }
0x103a   : > { %3037 = vmatprep.mubr.msk.f32.mxu1 %vm1511_vm6, %v2396_v41  ;;  %v2397_v43 = vmul.f32 %v3204_v42, %v2381_v62 }
0x103c   : > { %3038 = vmatmul.mubr.msk.f32.vlgmr.msra.gmra.mrb[0].mxu1 %vm1511_vm6, %v2397_v43 }
0x110f   : > { %v3039_v45 = vpop.f32.mrb[0].mxu1 }
0x1110   : > { %v2491_v46 = vmul.f32 10.0, %v3039_v45  ;;  %v2481_v47 = vpop.f32.mrb[1].mxu1 }
0x1111   : > { %v2490_v48 = vmul.f32 10.0, %v2481_v47 }
0x1112   : > { %v2495_v49 = vsel %vm1463_vm5, %v2491_v46, -inf }
0x1113   : > { %2496 = vmax.xlane.f32.xlu0 %v2495_v49  ;;  %v2492_v50 = vsel %vm1463_vm5, %v2490_v48, -inf }
0x1114   : > { %2493 = vmax.xlane.f32.xlu1 %v2492_v50 }
0x1125   : > { %2521 = vperm.xlu1 %3195, %v2518_v51  }
0x1129   : > { %2524 = vperm.xlu0 %3196, %v2519_v0  }
0x11a0   : > { %v2497_v52 = vpop.xlane.xlu0 %2496 }
0x11a1   : > { %v2499_v1 = vsub.f32 %v2491_v46, %v2497_v52  ;;  %v2494_v53 = vpop.xlane.xlu1 %2493 }
0x11a2   : > { %v2498_v54 = vsub.f32 %v2490_v48, %v2494_v53 }
0x11a3   : > { %v2502_v55 = vmul.f32 1.442695, %v2499_v1 }
0x11a4   : > { %v2500_v56 = vmul.f32 1.442695, %v2498_v54 }
0x11a5   : > { %3205 = vpow2.f32 %v2502_v55  ;;  %v2522_v59 = vpop.permute.xlu1 %2521 }
0x11a6   : > { %3207 = vpow2.f32 %v2500_v56  ;;  %vm2526_vm10 = vcmp.eq.s32.totalorder %v2517_v58, %v2522_v59 }
0x11a7   : > { %v2528_v4 = vsel %vm2526_vm10, %v2490_v48, 0.0 }
0x11a8   : > { %v2525_v63 = vpop.permute.xlu0 %2524  ;;  %v2530_v5 = vsel %vm1463_vm5, %v2528_v4, 0.0 }
0x11a9   : > { %vm2527_vm11 = vcmp.eq.s32.totalorder %v2517_v58, %v2525_v63 }
0x11aa   : > { %v2529_v6 = vsel %vm2527_vm11, %v2491_v46, 0.0 }
0x11ab   : > { %v2533_v7 = vsel %vm1463_vm5, %v2529_v6, 0.0 }
0x11af   : > { %v3206_v60 = vpop.eup %3205 }
0x11b0   : > { %v3208_v61 = vpop.eup %3207  ;;  %v2507_v2 = vsel %vm1463_vm5, %v3206_v60, 0.0 }
0x11b1   : > { %2508 = vadd.xlane.f32.xlu0 %v2507_v2  ;;  %v2504_v3 = vsel %vm1463_vm5, %v3208_v61, 0.0 }
0x11b2   : > { %2505 = vadd.xlane.f32.xlu1 %v2504_v3 }
0x11b6   : > { %2531 = vadd.xlane.f32.xlu1 %v2530_v5 }
0x11ba   : > { %2534 = vadd.xlane.f32.xlu1 %v2533_v7 }
0x123e   : > { %v2509_v8 = vpop.xlane.xlu0 %2508 }
0x123f   : > { %3209 = vlog2.f32 %v2509_v8  ;;  %v2506_v9 = vpop.xlane.xlu1 %2505 }
0x1240   : > { %3211 = vlog2.f32 %v2506_v9 }
0x1243   : > { %v2532_v11 = vpop.xlane.xlu1 %2531 }
0x1247   : > { %v2535_v19 = vpop.xlane.xlu1 %2534 }
0x1249   : > { %v3210_v12 = vpop.eup %3209 }
0x124a   : > { %v3212_v13 = vpop.eup %3211  ;;  %v2513_v14 = vmul.f32 0.6931472, %v3210_v12 }
0x124b   : > { %v2511_v15 = vmul.f32 0.6931472, %v3212_v13 }
0x124c   : > { %v2515_v16 = vadd.f32 %v2513_v14, %v2497_v52 }
0x124d   : > { %v2514_v17 = vadd.f32 %v2511_v15, %v2494_v53 }
0x124e   : > { %v2537_v21 = vsub.f32 %v2515_v16, %v2535_v19 }
0x124f   : > { %v2536_v22 = vsub.f32 %v2514_v17, %v2532_v11 }
0x1250   : > { %v2541_v23 = vmul.f32 %v2539_v18, %v2537_v21 }
0x1251   : > { %v2540_v24 = vmul.f32 %v2538_v20, %v2536_v22 }
0x1252   : > { %v2544_v25 = vsel %vm2542_vm12, %v2541_v23, 0.0 }
0x1253   : > { %v2543_v26 = vsel %vm2542_vm12, %v2540_v24, 0.0 }
0x1254   : > { %v2545_v28 = vadd.f32 %v2544_v25, %v2543_v26 }
0x1256   : > { %2546 = vadd.xlane.f32.xlu1 %v2545_v28 }
0x12e3   : > { %v2547_v62 = vpop.xlane.xlu1 %2546 }
0x12e4   : > { %v2548_v29 = vrot.slane %v2547_v62, 4 }
0x12e6   : > { %v2549_v30 = vadd.f32 %v2548_v29, %v2547_v62 }
0x12e8   : > { %v2550_v31 = vrot.slane %v2549_v30, 2 }
0x12ea   : > { %v2551_v32 = vadd.f32 %v2550_v31, %v2549_v30 }
0x12ec   : > { %v2552_v33 = vrot.slane %v2551_v32, 1 }
0x12ee   : > { %v2553_v27 = vadd.f32 %v2552_v33, %v2551_v32 }
0x12f0   : > { %3042 = vpush %v2553_v27 }
0x1321   : > { %s3043_s5 = spop %3042 }
0x1322   : > { %v2555_v34 = vstv %s3043_s5 }
0x1323   : > { %2556 = vst [vmem:[%s3528_s19] sm:$0xff] %v2555_v34 }
0x1324 PF: > { %s3923_s24 = sld [smem:[#allocation6_spill]]  ;;  %s3924_s7 = sld [smem:[#allocation4_spill]] }
0x1325   : > { %s3925_s4 = sld [smem:[#allocation5_spill]]  ;;  %s3926_s8 = sld [smem:[#allocation7_spill]] }
0x1326   : > { %s3927_s30 = sld [smem:[#allocation8_spill]] }
0x132a   : > { %s38_s9 = sadd.s32 1, %s3923_s24  }
0x132b   : > { %p35_p9 = scmp.ge.s32.totalorder %s38_s9, 6  }
0x132d   :  { %37 = sbr.rel (!%p35_p9) target bundleno = 23 (0x17), region = 216 }

</bundles_post_ra>
